<compile_context>
chip_gen: v7x
topology: tpu7x:2x2x1
jax: 0.10.0
libtpu: 0.0.40
codegen_flags: <defaults>
</compile_context>

<pallas_src>
import functools

import jax
import jax.numpy as jnp
from jax import lax
from jax.experimental import pallas as pl
from jax.experimental.pallas import tpu as pltpu


# ----------------------------------------------------------------------------
# XLA-side helpers (layout plumbing; shared with the pure-JAX reference)
# ----------------------------------------------------------------------------
def _positional_encoding(noise_level, n_channels):
    """gamma = [sin, cos](5000 * noise * 1e-4**(i/half)), shape (B, n_channels)."""
    nl = noise_level.reshape(-1).astype(jnp.float32)
    half = n_channels // 2
    exps = 0.0001 ** (jnp.arange(half, dtype=jnp.float32) / float(half))
    arg = 5000.0 * nl[:, None] * exps[None, :]
    return jnp.concatenate([jnp.sin(arg), jnp.cos(arg)], axis=-1)


def _upconv_and_concat_ncl(x_ncl, skip_ncl, wt, bt):
    """ConvTranspose1d(k=2,s=2) upsample + optional nearest resize + channel concat.

    x_ncl: (B, Cin, Lin), skip_ncl: (B, Cskip, Ls), wt: (Cin, Chalf, 2), bt: (Chalf,)
    returns NCL float32 (B, Chalf + Cskip, Ls).
    """
    x32 = x_ncl.astype(jnp.float32)
    # u[b, o, 2l+k] = sum_c x[b, c, l] * wt[c, o, k] + bt[o]
    u = jnp.einsum("bcl,cok->bolk", x32, wt.astype(jnp.float32))
    B, ch, lin, _ = u.shape
    u = u.reshape(B, ch, 2 * lin) + bt[None, :, None]
    ls = skip_ncl.shape[2]
    if u.shape[2] != ls:                                  # F.interpolate(mode="nearest")
        idx = (jnp.arange(ls) * u.shape[2]) // ls
        u = jnp.take(u, idx, axis=2)
    return jnp.concatenate([u, skip_ncl.astype(jnp.float32)], axis=1)


def _conv_weight_im2col(w_oik):
    """PyTorch Conv1d weight (Cout, Cin, 3) -> im2col matrix (3*Cin, Cout), bf16 (ref only)."""
    cout, cin, k = w_oik.shape
    return jnp.transpose(w_oik, (2, 1, 0)).reshape(k * cin, cout).astype(jnp.bfloat16)


# ----------------------------------------------------------------------------
# Fused Pallas kernel: ConvBlock1 -> ConvBlock2 (intermediate resident in VMEM)
# ----------------------------------------------------------------------------
def _decoder_convblocks_kernel(xin_ref, gamma_ref, w1_ref, w2_ref, p_ref,
                               o_ref, h_ref, *, Ls):
    """xin_ref:   (B, C1, Ls+2)   bf16, NCL with zero halo lanes (pre-padded)
       gamma_ref: (B, Cout, 1)    f32 positional-encoding scale
       w1_ref:    (3, Cout, C1)   bf16 per-tap conv-1 weights
       w2_ref:    (3, Cout, Cout) bf16 per-tap conv-2 weights
       p_ref:     (Cout, 6)       f32 columns: [b1, bn_w1, bn_b1, b2, bn_w2, bn_b2]
       o_ref:     (B, Cout, Ls)   f32 output, PyTorch NCL layout (length lane-dense)
       h_ref:     (B, Cout, Ls+2) bf16 scratch, zero-halo block-1 activation
    """
    B = xin_ref.shape[0]
    cout = o_ref.shape[1]
    inv_n = 1.0 / float(B * Ls)

    def conv3_taps(src_ref, w_ref, bias):
        """Accumulated-tap k=3 conv on a zero-halo NCL ref -> per-batch (Cout, Ls) f32."""
        ys = []
        for b in range(B):
            acc = bias                                           # (Cout, 1) f32
            for k in range(3):
                acc = acc + jnp.dot(w_ref[k], src_ref[b, :, pl.ds(k, Ls)],
                                    preferred_element_type=jnp.float32)
            ys.append(acc)                                       # (Cout, Ls) f32
        return ys

    def bn_relu_gamma(ys, bn_w, bn_b):
        """Training-mode BatchNorm1d (single-pass f32 stats over B*Ls) + ReLU + gamma."""
        tot = ys[0]
        tot_sq = ys[0] * ys[0]
        for y in ys[1:]:
            tot = tot + y
            tot_sq = tot_sq + y * y
        mean = jnp.sum(tot, axis=1, keepdims=True) * inv_n       # (Cout, 1)
        ex2 = jnp.sum(tot_sq, axis=1, keepdims=True) * inv_n
        var = jnp.maximum(ex2 - mean * mean, 0.0)                # clamp cancellation
        scale = lax.rsqrt(var + 1e-5) * bn_w
        shift = bn_b - mean * scale
        return [jnp.maximum(y * scale + shift, 0.0) * gamma_ref[b]
                for b, y in enumerate(ys)]

    # ---- ConvBlock 1: conv -> BN -> ReLU -> gamma (input ref already zero-haloed) ----
    a1 = bn_relu_gamma(conv3_taps(xin_ref, w1_ref, p_ref[:, 0:1]),
                       p_ref[:, 1:2], p_ref[:, 2:3])

    # Block-1 activation stays resident in VMEM (bf16); zero only the 2 halo columns.
    zcol = jnp.zeros((cout, 1), jnp.bfloat16)
    for b in range(B):
        h_ref[b, :, 0:1] = zcol
        h_ref[b, :, Ls + 1:Ls + 2] = zcol
        h_ref[b, :, pl.ds(1, Ls)] = a1[b].astype(jnp.bfloat16)

    # ---- ConvBlock 2: conv -> BN -> ReLU -> gamma, written straight out in NCL ----
    a2 = bn_relu_gamma(conv3_taps(h_ref, w2_ref, p_ref[:, 3:4]),
                       p_ref[:, 4:5], p_ref[:, 5:6])
    for b in range(B):
        o_ref[b, :, :] = a2[b].astype(o_ref.dtype)


def _fused_conv_blocks(xin_pad, gamma, w1t, w2t, pvec):
    B, C1, Lp = xin_pad.shape
    Ls = Lp - 2
    cout = w1t.shape[1]
    kernel = functools.partial(_decoder_convblocks_kernel, Ls=Ls)
    return pl.pallas_call(
        kernel,
        out_shape=jax.ShapeDtypeStruct((B, cout, Ls), jnp.float32),
        grid=(1,),
        in_specs=[
            pl.BlockSpec((B, C1, Lp), lambda i: (0, 0, 0)),
            pl.BlockSpec((B, cout, 1), lambda i: (0, 0, 0)),
            pl.BlockSpec((3, cout, C1), lambda i: (0, 0, 0)),
            pl.BlockSpec((3, cout, cout), lambda i: (0, 0, 0)),
            pl.BlockSpec((cout, 6), lambda i: (0, 0)),
        ],
        out_specs=pl.BlockSpec((B, cout, Ls), lambda i: (0, 0, 0)),
        scratch_shapes=[pltpu.VMEM((B, cout, Ls + 2), jnp.bfloat16)],
        compiler_params=pltpu.CompilerParams(
            dimension_semantics=("arbitrary",),
            vmem_limit_bytes=32 * 1024 * 1024),
    )(xin_pad, gamma, w1t, w2t, pvec)


# ----------------------------------------------------------------------------
# Decoder wrapper (PyTorch NCL in / NCL out)
# ----------------------------------------------------------------------------
def decoder_pallas(x_ncl, noise_level, skip_ncl, params):
    xin = _upconv_and_concat_ncl(x_ncl, skip_ncl, params["wt"], params["bt"])    # (B, C1, Ls)
    cout = params["w1"].shape[0]
    # bf16 staging + zero halo lanes for the k=3 / pad=1 conv (fused XLA pad).
    xin_pad = jnp.pad(xin, ((0, 0), (0, 0), (1, 1))).astype(jnp.bfloat16)        # (B, C1, Ls+2)
    gamma = _positional_encoding(noise_level, cout)[:, :, None]                  # (B, Cout, 1)
    w1t = jnp.transpose(params["w1"], (2, 0, 1)).astype(jnp.bfloat16)            # (3, Cout, C1)
    w2t = jnp.transpose(params["w2"], (2, 0, 1)).astype(jnp.bfloat16)            # (3, Cout, Cout)
    pvec = jnp.stack([params["b1"], params["bn_w1"], params["bn_b1"],
                      params["b2"], params["bn_w2"], params["bn_b2"]], axis=1)   # (Cout, 6)
    return _fused_conv_blocks(xin_pad, gamma, w1t, w2t, pvec)


# ----------------------------------------------------------------------------
# Pure-JAX reference (mirrors the PyTorch forward, training-mode BatchNorm)
# ----------------------------------------------------------------------------
def decoder_ref(x_ncl, noise_level, skip_ncl, params):
    xin = jnp.transpose(
        _upconv_and_concat_ncl(x_ncl, skip_ncl, params["wt"], params["bt"]),
        (0, 2, 1))                                                               # (B, Ls, C1)
    cout = params["w1"].shape[0]
    gamma = _positional_encoding(noise_level, cout)

    def conv_block(h, w_oik, b, bnw, bnb):
        B, L, cin = h.shape
        hp = jnp.pad(h, ((0, 0), (1, 1), (0, 0)))
        cols = jnp.concatenate([hp[:, k:k + L, :] for k in range(3)], axis=-1)
        w2d = _conv_weight_im2col(w_oik)
        y = jnp.dot(cols.reshape(B * L, 3 * cin).astype(jnp.bfloat16), w2d,
                    preferred_element_type=jnp.float32).reshape(B, L, -1)
        y = y + b[None, None, :]
        mean = jnp.mean(y, axis=(0, 1), keepdims=True)
        var = jnp.maximum(jnp.mean(y * y, axis=(0, 1), keepdims=True) - mean * mean, 0.0)
        y = (y - mean) * lax.rsqrt(var + 1e-5) * bnw[None, None, :] + bnb[None, None, :]
        y = jnp.maximum(y, 0.0)
        return y * gamma[:, None, :]

    y = conv_block(xin, params["w1"], params["b1"], params["bn_w1"], params["bn_b1"])
    y = conv_block(y, params["w2"], params["b2"], params["bn_w2"], params["bn_b2"])
    return jnp.transpose(y, (0, 2, 1))                                           # (B, Cout, Ls)


# ----------------------------------------------------------------------------
# Deterministic parameter init (orthogonal conv weights like the PyTorch init)
# ----------------------------------------------------------------------------
def init_params(key, in_channels, out_channels):
    c_half = in_channels // 2
    c1_in = c_half + c_half
    keys = jax.random.split(key, 6)
    ortho = jax.nn.initializers.orthogonal()
    wt = 0.3 * jax.random.normal(keys[0], (in_channels, c_half, 2), jnp.float32)
    bt = 0.1 * jax.random.normal(keys[1], (c_half,), jnp.float32)
    w1 = ortho(keys[2], (out_channels, c1_in * 3)).reshape(out_channels, c1_in, 3)
    w2 = ortho(keys[3], (out_channels, out_channels * 3)).reshape(out_channels, out_channels, 3)
    b1 = 0.1 * jax.random.normal(keys[4], (out_channels,), jnp.float32)
    b2 = 0.1 * jax.random.normal(keys[5], (out_channels,), jnp.float32)
    return dict(
        wt=wt, bt=bt,
        w1=w1.astype(jnp.float32), b1=b1,
        w2=w2.astype(jnp.float32), b2=b2,
        bn_w1=jnp.ones((out_channels,), jnp.float32),
        bn_b1=jnp.zeros((out_channels,), jnp.float32),
        bn_w2=jnp.ones((out_channels,), jnp.float32),
        bn_b2=jnp.zeros((out_channels,), jnp.float32),
    )


if __name__ == "__main__":
    B, C_IN, C_OUT, L_IN = 2, 8, 32, 16
    L_SKIP = 2 * L_IN                                   # upconv doubles the length

    key = jax.random.PRNGKey(0)
    kx, ks, kn, kp = jax.random.split(key, 4)
    x = jax.random.normal(kx, (B, C_IN, L_IN), jnp.float32)             # bottleneck features (NCL)
    skip = jax.random.normal(ks, (B, C_IN // 2, L_SKIP), jnp.float32)   # encoder skip (NCL)
    noise_level = jax.random.uniform(kn, (B,), jnp.float32)
    params = init_params(kp, C_IN, C_OUT)

    out = jax.block_until_ready(decoder_pallas(x, noise_level, skip, params))
    ref = decoder_ref(x, noise_level, skip, params)

    assert out.shape == (B, C_OUT, L_SKIP), out.shape
    assert bool(jnp.all(jnp.isfinite(out)))
    max_err = float(jnp.max(jnp.abs(out - ref)))
    assert jnp.allclose(out, ref, atol=2e-3, rtol=2e-3), max_err
    print("KERNEL_OK")
</pallas_src>

<mosaic_0001>
module attributes {stable_mosaic.version = 11 : i64} {
  func.func @_decoder_convblocks_kernel(%arg0: i32, %arg1: memref<2x8x34xbf16, #tpu.memory_space<vmem>>, %arg2: memref<2x32x1xf32, #tpu.memory_space<vmem>>, %arg3: memref<3x32x8xbf16, #tpu.memory_space<vmem>>, %arg4: memref<3x32x32xbf16, #tpu.memory_space<vmem>>, %arg5: memref<32x6xf32, #tpu.memory_space<vmem>>, %arg6: memref<2x32x32xf32, #tpu.memory_space<vmem>>, %arg7: memref<2x32x34xbf16, #tpu.memory_space<vmem>>) attributes {dimension_semantics = [#tpu.dimension_semantics<arbitrary>], iteration_bounds = array<i64: 1>, scalar_prefetch = 0 : i64, scratch_operands = 1 : i64, tpu.core_type = #tpu.core_type<tc>, window_params = [{pipeline_mode = #tpu.pipeline_mode<synchronous>, transform_indices = @transform_0, window_bounds = array<i64: 2, 8, 34>}, {pipeline_mode = #tpu.pipeline_mode<synchronous>, transform_indices = @transform_1, window_bounds = array<i64: 2, 32, 1>}, {pipeline_mode = #tpu.pipeline_mode<synchronous>, transform_indices = @transform_2, window_bounds = array<i64: 3, 32, 8>}, {pipeline_mode = #tpu.pipeline_mode<synchronous>, transform_indices = @transform_3, window_bounds = array<i64: 3, 32, 32>}, {pipeline_mode = #tpu.pipeline_mode<synchronous>, transform_indices = @transform_4, window_bounds = array<i64: 32, 6>}, {pipeline_mode = #tpu.pipeline_mode<synchronous>, transform_indices = @transform_5, window_bounds = array<i64: 2, 32, 32>}]} {
    %c0 = arith.constant 0 : index
    %c0_0 = arith.constant 0 : index
    %0 = vector.load %arg5[%c0, %c0_0] : memref<32x6xf32, #tpu.memory_space<vmem>>, vector<32x1xf32>
    %c0_1 = arith.constant 0 : index
    %c0_2 = arith.constant 0 : index
    %c0_3 = arith.constant 0 : index
    %1 = vector.load %arg3[%c0_1, %c0_2, %c0_3] : memref<3x32x8xbf16, #tpu.memory_space<vmem>>, vector<1x32x8xbf16>
    %2 = vector.shape_cast %1 : vector<1x32x8xbf16> to vector<32x8xbf16>
    %c0_4 = arith.constant 0 : index
    %c0_5 = arith.constant 0 : index
    %c0_6 = arith.constant 0 : index
    %3 = vector.load %arg1[%c0_4, %c0_5, %c0_6] : memref<2x8x34xbf16, #tpu.memory_space<vmem>>, vector<1x8x32xbf16>
    %4 = vector.shape_cast %3 : vector<1x8x32xbf16> to vector<8x32xbf16>
    %cst = arith.constant dense<0.000000e+00> : vector<32x32xf32>
    %5 = tpu.matmul %2, %4, %cst {dimension_numbers = #tpu.dot_dimension_numbers<[1], [0], [0], [1], [0, 0, 1, 1], [], []>} : vector<32x8xbf16>, vector<8x32xbf16>, vector<32x32xf32> -> vector<32x32xf32>
    %6 = vector.broadcast %0 : vector<32x1xf32> to vector<32x32xf32>
    %7 = arith.addf %6, %5 : vector<32x32xf32>
    %c1 = arith.constant 1 : index
    %c0_7 = arith.constant 0 : index
    %c0_8 = arith.constant 0 : index
    %8 = vector.load %arg3[%c1, %c0_7, %c0_8] : memref<3x32x8xbf16, #tpu.memory_space<vmem>>, vector<1x32x8xbf16>
    %9 = vector.shape_cast %8 : vector<1x32x8xbf16> to vector<32x8xbf16>
    %c0_9 = arith.constant 0 : index
    %c0_10 = arith.constant 0 : index
    %c1_11 = arith.constant 1 : index
    %10 = vector.load %arg1[%c0_9, %c0_10, %c1_11] : memref<2x8x34xbf16, #tpu.memory_space<vmem>>, vector<1x8x32xbf16>
    %11 = vector.shape_cast %10 : vector<1x8x32xbf16> to vector<8x32xbf16>
    %cst_12 = arith.constant dense<0.000000e+00> : vector<32x32xf32>
    %12 = tpu.matmul %9, %11, %cst_12 {dimension_numbers = #tpu.dot_dimension_numbers<[1], [0], [0], [1], [0, 0, 1, 1], [], []>} : vector<32x8xbf16>, vector<8x32xbf16>, vector<32x32xf32> -> vector<32x32xf32>
    %13 = arith.addf %7, %12 : vector<32x32xf32>
    %c2 = arith.constant 2 : index
    %c0_13 = arith.constant 0 : index
    %c0_14 = arith.constant 0 : index
    %14 = vector.load %arg3[%c2, %c0_13, %c0_14] : memref<3x32x8xbf16, #tpu.memory_space<vmem>>, vector<1x32x8xbf16>
    %15 = vector.shape_cast %14 : vector<1x32x8xbf16> to vector<32x8xbf16>
    %c0_15 = arith.constant 0 : index
    %c0_16 = arith.constant 0 : index
    %c2_17 = arith.constant 2 : index
    %16 = vector.load %arg1[%c0_15, %c0_16, %c2_17] : memref<2x8x34xbf16, #tpu.memory_space<vmem>>, vector<1x8x32xbf16>
    %17 = vector.shape_cast %16 : vector<1x8x32xbf16> to vector<8x32xbf16>
    %cst_18 = arith.constant dense<0.000000e+00> : vector<32x32xf32>
    %18 = tpu.matmul %15, %17, %cst_18 {dimension_numbers = #tpu.dot_dimension_numbers<[1], [0], [0], [1], [0, 0, 1, 1], [], []>} : vector<32x8xbf16>, vector<8x32xbf16>, vector<32x32xf32> -> vector<32x32xf32>
    %19 = arith.addf %13, %18 : vector<32x32xf32>
    %c0_19 = arith.constant 0 : index
    %c0_20 = arith.constant 0 : index
    %c0_21 = arith.constant 0 : index
    %20 = vector.load %arg3[%c0_19, %c0_20, %c0_21] : memref<3x32x8xbf16, #tpu.memory_space<vmem>>, vector<1x32x8xbf16>
    %21 = vector.shape_cast %20 : vector<1x32x8xbf16> to vector<32x8xbf16>
    %c1_22 = arith.constant 1 : index
    %c0_23 = arith.constant 0 : index
    %c0_24 = arith.constant 0 : index
    %22 = vector.load %arg1[%c1_22, %c0_23, %c0_24] : memref<2x8x34xbf16, #tpu.memory_space<vmem>>, vector<1x8x32xbf16>
    %23 = vector.shape_cast %22 : vector<1x8x32xbf16> to vector<8x32xbf16>
    %cst_25 = arith.constant dense<0.000000e+00> : vector<32x32xf32>
    %24 = tpu.matmul %21, %23, %cst_25 {dimension_numbers = #tpu.dot_dimension_numbers<[1], [0], [0], [1], [0, 0, 1, 1], [], []>} : vector<32x8xbf16>, vector<8x32xbf16>, vector<32x32xf32> -> vector<32x32xf32>
    %25 = vector.broadcast %0 : vector<32x1xf32> to vector<32x32xf32>
    %26 = arith.addf %25, %24 : vector<32x32xf32>
    %c1_26 = arith.constant 1 : index
    %c0_27 = arith.constant 0 : index
    %c0_28 = arith.constant 0 : index
    %27 = vector.load %arg3[%c1_26, %c0_27, %c0_28] : memref<3x32x8xbf16, #tpu.memory_space<vmem>>, vector<1x32x8xbf16>
    %28 = vector.shape_cast %27 : vector<1x32x8xbf16> to vector<32x8xbf16>
    %c1_29 = arith.constant 1 : index
    %c0_30 = arith.constant 0 : index
    %c1_31 = arith.constant 1 : index
    %29 = vector.load %arg1[%c1_29, %c0_30, %c1_31] : memref<2x8x34xbf16, #tpu.memory_space<vmem>>, vector<1x8x32xbf16>
    %30 = vector.shape_cast %29 : vector<1x8x32xbf16> to vector<8x32xbf16>
    %cst_32 = arith.constant dense<0.000000e+00> : vector<32x32xf32>
    %31 = tpu.matmul %28, %30, %cst_32 {dimension_numbers = #tpu.dot_dimension_numbers<[1], [0], [0], [1], [0, 0, 1, 1], [], []>} : vector<32x8xbf16>, vector<8x32xbf16>, vector<32x32xf32> -> vector<32x32xf32>
    %32 = arith.addf %26, %31 : vector<32x32xf32>
    %c2_33 = arith.constant 2 : index
    %c0_34 = arith.constant 0 : index
    %c0_35 = arith.constant 0 : index
    %33 = vector.load %arg3[%c2_33, %c0_34, %c0_35] : memref<3x32x8xbf16, #tpu.memory_space<vmem>>, vector<1x32x8xbf16>
    %34 = vector.shape_cast %33 : vector<1x32x8xbf16> to vector<32x8xbf16>
    %c1_36 = arith.constant 1 : index
    %c0_37 = arith.constant 0 : index
    %c2_38 = arith.constant 2 : index
    %35 = vector.load %arg1[%c1_36, %c0_37, %c2_38] : memref<2x8x34xbf16, #tpu.memory_space<vmem>>, vector<1x8x32xbf16>
    %36 = vector.shape_cast %35 : vector<1x8x32xbf16> to vector<8x32xbf16>
    %cst_39 = arith.constant dense<0.000000e+00> : vector<32x32xf32>
    %37 = tpu.matmul %34, %36, %cst_39 {dimension_numbers = #tpu.dot_dimension_numbers<[1], [0], [0], [1], [0, 0, 1, 1], [], []>} : vector<32x8xbf16>, vector<8x32xbf16>, vector<32x32xf32> -> vector<32x32xf32>
    %38 = arith.addf %32, %37 : vector<32x32xf32>
    %c0_40 = arith.constant 0 : index
    %c1_41 = arith.constant 1 : index
    %39 = vector.load %arg5[%c0_40, %c1_41] : memref<32x6xf32, #tpu.memory_space<vmem>>, vector<32x1xf32>
    %c0_42 = arith.constant 0 : index
    %c2_43 = arith.constant 2 : index
    %40 = vector.load %arg5[%c0_42, %c2_43] : memref<32x6xf32, #tpu.memory_space<vmem>>, vector<32x1xf32>
    %41 = arith.mulf %19, %19 : vector<32x32xf32>
    %42 = arith.addf %19, %38 : vector<32x32xf32>
    %43 = arith.mulf %38, %38 : vector<32x32xf32>
    %44 = arith.addf %41, %43 : vector<32x32xf32>
    %cst_44 = arith.constant dense<0.000000e+00> : vector<32xf32>
    %45 = vector.multi_reduction <add>, %42, %cst_44 [1] : vector<32x32xf32> to vector<32xf32>
    %46 = vector.shape_cast %45 : vector<32xf32> to vector<32x1xf32>
    %cst_45 = arith.constant 1.562500e-02 : f32
    %47 = vector.broadcast %cst_45 : f32 to vector<32x1xf32>
    %48 = arith.mulf %46, %47 : vector<32x1xf32>
    %cst_46 = arith.constant dense<0.000000e+00> : vector<32xf32>
    %49 = vector.multi_reduction <add>, %44, %cst_46 [1] : vector<32x32xf32> to vector<32xf32>
    %50 = vector.shape_cast %49 : vector<32xf32> to vector<32x1xf32>
    %cst_47 = arith.constant 1.562500e-02 : f32
    %51 = vector.broadcast %cst_47 : f32 to vector<32x1xf32>
    %52 = arith.mulf %50, %51 : vector<32x1xf32>
    %53 = arith.mulf %48, %48 : vector<32x1xf32>
    %54 = arith.subf %52, %53 : vector<32x1xf32>
    %cst_48 = arith.constant 0.000000e+00 : f32
    %55 = vector.broadcast %cst_48 : f32 to vector<32x1xf32>
    %56 = arith.maximumf %54, %55 : vector<32x1xf32>
    %cst_49 = arith.constant 9.99999974E-6 : f32
    %57 = vector.broadcast %cst_49 : f32 to vector<32x1xf32>
    %58 = arith.addf %56, %57 : vector<32x1xf32>
    %59 = math.rsqrt %58 : vector<32x1xf32>
    %60 = arith.mulf %59, %39 : vector<32x1xf32>
    %61 = arith.mulf %48, %60 : vector<32x1xf32>
    %62 = arith.subf %40, %61 : vector<32x1xf32>
    %63 = vector.broadcast %60 : vector<32x1xf32> to vector<32x32xf32>
    %64 = arith.mulf %19, %63 : vector<32x32xf32>
    %65 = vector.broadcast %62 : vector<32x1xf32> to vector<32x32xf32>
    %66 = arith.addf %64, %65 : vector<32x32xf32>
    %cst_50 = arith.constant 0.000000e+00 : f32
    %67 = vector.broadcast %cst_50 : f32 to vector<32x32xf32>
    %68 = arith.maximumf %66, %67 : vector<32x32xf32>
    %c0_51 = arith.constant 0 : index
    %c0_52 = arith.constant 0 : index
    %c0_53 = arith.constant 0 : index
    %69 = vector.load %arg2[%c0_51, %c0_52, %c0_53] : memref<2x32x1xf32, #tpu.memory_space<vmem>>, vector<1x32x1xf32>
    %70 = vector.shape_cast %69 : vector<1x32x1xf32> to vector<32x1xf32>
    %71 = vector.broadcast %70 : vector<32x1xf32> to vector<32x32xf32>
    %72 = arith.mulf %68, %71 : vector<32x32xf32>
    %73 = vector.broadcast %60 : vector<32x1xf32> to vector<32x32xf32>
    %74 = arith.mulf %38, %73 : vector<32x32xf32>
    %75 = vector.broadcast %62 : vector<32x1xf32> to vector<32x32xf32>
    %76 = arith.addf %74, %75 : vector<32x32xf32>
    %cst_54 = arith.constant 0.000000e+00 : f32
    %77 = vector.broadcast %cst_54 : f32 to vector<32x32xf32>
    %78 = arith.maximumf %76, %77 : vector<32x32xf32>
    %c1_55 = arith.constant 1 : index
    %c0_56 = arith.constant 0 : index
    %c0_57 = arith.constant 0 : index
    %79 = vector.load %arg2[%c1_55, %c0_56, %c0_57] : memref<2x32x1xf32, #tpu.memory_space<vmem>>, vector<1x32x1xf32>
    %80 = vector.shape_cast %79 : vector<1x32x1xf32> to vector<32x1xf32>
    %81 = vector.broadcast %80 : vector<32x1xf32> to vector<32x32xf32>
    %82 = arith.mulf %78, %81 : vector<32x32xf32>
    %cst_58 = arith.constant 0.000000e+00 : bf16
    %83 = vector.broadcast %cst_58 : bf16 to vector<32x1xbf16>
    %c0_59 = arith.constant 0 : index
    %c0_60 = arith.constant 0 : index
    %c0_61 = arith.constant 0 : index
    %84 = vector.load %arg7[%c0_59, %c0_60, %c0_61] : memref<2x32x34xbf16, #tpu.memory_space<vmem>>, vector<1x32x1xbf16>
    %85 = vector.shape_cast %84 : vector<1x32x1xbf16> to vector<32x1xbf16>
    %86 = vector.shape_cast %83 : vector<32x1xbf16> to vector<1x32x1xbf16>
    tpu.vector_store %arg7[%c0_59, %c0_60, %c0_61], %86 {strides = array<i32>} : memref<2x32x34xbf16, #tpu.memory_space<vmem>>, vector<1x32x1xbf16>,
    %c0_62 = arith.constant 0 : index
    %c0_63 = arith.constant 0 : index
    %c33 = arith.constant 33 : index
    %87 = vector.load %arg7[%c0_62, %c0_63, %c33] : memref<2x32x34xbf16, #tpu.memory_space<vmem>>, vector<1x32x1xbf16>
    %88 = vector.shape_cast %87 : vector<1x32x1xbf16> to vector<32x1xbf16>
    %89 = vector.shape_cast %83 : vector<32x1xbf16> to vector<1x32x1xbf16>
    tpu.vector_store %arg7[%c0_62, %c0_63, %c33], %89 {strides = array<i32>} : memref<2x32x34xbf16, #tpu.memory_space<vmem>>, vector<1x32x1xbf16>,
    %90 = arith.truncf %72 : vector<32x32xf32> to vector<32x32xbf16>
    %c0_64 = arith.constant 0 : index
    %c0_65 = arith.constant 0 : index
    %c1_66 = arith.constant 1 : index
    %91 = vector.load %arg7[%c0_64, %c0_65, %c1_66] : memref<2x32x34xbf16, #tpu.memory_space<vmem>>, vector<1x32x32xbf16>
    %92 = vector.shape_cast %91 : vector<1x32x32xbf16> to vector<32x32xbf16>
    %93 = vector.shape_cast %90 : vector<32x32xbf16> to vector<1x32x32xbf16>
    tpu.vector_store %arg7[%c0_64, %c0_65, %c1_66], %93 {strides = array<i32>} : memref<2x32x34xbf16, #tpu.memory_space<vmem>>, vector<1x32x32xbf16>,
    %c1_67 = arith.constant 1 : index
    %c0_68 = arith.constant 0 : index
    %c0_69 = arith.constant 0 : index
    %94 = vector.load %arg7[%c1_67, %c0_68, %c0_69] : memref<2x32x34xbf16, #tpu.memory_space<vmem>>, vector<1x32x1xbf16>
    %95 = vector.shape_cast %94 : vector<1x32x1xbf16> to vector<32x1xbf16>
    %96 = vector.shape_cast %83 : vector<32x1xbf16> to vector<1x32x1xbf16>
    tpu.vector_store %arg7[%c1_67, %c0_68, %c0_69], %96 {strides = array<i32>} : memref<2x32x34xbf16, #tpu.memory_space<vmem>>, vector<1x32x1xbf16>,
    %c1_70 = arith.constant 1 : index
    %c0_71 = arith.constant 0 : index
    %c33_72 = arith.constant 33 : index
    %97 = vector.load %arg7[%c1_70, %c0_71, %c33_72] : memref<2x32x34xbf16, #tpu.memory_space<vmem>>, vector<1x32x1xbf16>
    %98 = vector.shape_cast %97 : vector<1x32x1xbf16> to vector<32x1xbf16>
    %99 = vector.shape_cast %83 : vector<32x1xbf16> to vector<1x32x1xbf16>
    tpu.vector_store %arg7[%c1_70, %c0_71, %c33_72], %99 {strides = array<i32>} : memref<2x32x34xbf16, #tpu.memory_space<vmem>>, vector<1x32x1xbf16>,
    %100 = arith.truncf %82 : vector<32x32xf32> to vector<32x32xbf16>
    %c1_73 = arith.constant 1 : index
    %c0_74 = arith.constant 0 : index
    %c1_75 = arith.constant 1 : index
    %101 = vector.load %arg7[%c1_73, %c0_74, %c1_75] : memref<2x32x34xbf16, #tpu.memory_space<vmem>>, vector<1x32x32xbf16>
    %102 = vector.shape_cast %101 : vector<1x32x32xbf16> to vector<32x32xbf16>
    %103 = vector.shape_cast %100 : vector<32x32xbf16> to vector<1x32x32xbf16>
    tpu.vector_store %arg7[%c1_73, %c0_74, %c1_75], %103 {strides = array<i32>} : memref<2x32x34xbf16, #tpu.memory_space<vmem>>, vector<1x32x32xbf16>,
    %c0_76 = arith.constant 0 : index
    %c3 = arith.constant 3 : index
    %104 = vector.load %arg5[%c0_76, %c3] : memref<32x6xf32, #tpu.memory_space<vmem>>, vector<32x1xf32>
    %c0_77 = arith.constant 0 : index
    %c0_78 = arith.constant 0 : index
    %c0_79 = arith.constant 0 : index
    %105 = vector.load %arg4[%c0_77, %c0_78, %c0_79] : memref<3x32x32xbf16, #tpu.memory_space<vmem>>, vector<1x32x32xbf16>
    %106 = vector.shape_cast %105 : vector<1x32x32xbf16> to vector<32x32xbf16>
    %c0_80 = arith.constant 0 : index
    %c0_81 = arith.constant 0 : index
    %c0_82 = arith.constant 0 : index
    %107 = vector.load %arg7[%c0_80, %c0_81, %c0_82] : memref<2x32x34xbf16, #tpu.memory_space<vmem>>, vector<1x32x32xbf16>
    %108 = vector.shape_cast %107 : vector<1x32x32xbf16> to vector<32x32xbf16>
    %cst_83 = arith.constant dense<0.000000e+00> : vector<32x32xf32>
    %109 = tpu.matmul %106, %108, %cst_83 {dimension_numbers = #tpu.dot_dimension_numbers<[1], [0], [0], [1], [0, 0, 1, 1], [], []>} : vector<32x32xbf16>, vector<32x32xbf16>, vector<32x32xf32> -> vector<32x32xf32>
    %110 = vector.broadcast %104 : vector<32x1xf32> to vector<32x32xf32>
    %111 = arith.addf %110, %109 : vector<32x32xf32>
    %c1_84 = arith.constant 1 : index
    %c0_85 = arith.constant 0 : index
    %c0_86 = arith.constant 0 : index
    %112 = vector.load %arg4[%c1_84, %c0_85, %c0_86] : memref<3x32x32xbf16, #tpu.memory_space<vmem>>, vector<1x32x32xbf16>
    %113 = vector.shape_cast %112 : vector<1x32x32xbf16> to vector<32x32xbf16>
    %c0_87 = arith.constant 0 : index
    %c0_88 = arith.constant 0 : index
    %c1_89 = arith.constant 1 : index
    %114 = vector.load %arg7[%c0_87, %c0_88, %c1_89] : memref<2x32x34xbf16, #tpu.memory_space<vmem>>, vector<1x32x32xbf16>
    %115 = vector.shape_cast %114 : vector<1x32x32xbf16> to vector<32x32xbf16>
    %cst_90 = arith.constant dense<0.000000e+00> : vector<32x32xf32>
    %116 = tpu.matmul %113, %115, %cst_90 {dimension_numbers = #tpu.dot_dimension_numbers<[1], [0], [0], [1], [0, 0, 1, 1], [], []>} : vector<32x32xbf16>, vector<32x32xbf16>, vector<32x32xf32> -> vector<32x32xf32>
    %117 = arith.addf %111, %116 : vector<32x32xf32>
    %c2_91 = arith.constant 2 : index
    %c0_92 = arith.constant 0 : index
    %c0_93 = arith.constant 0 : index
    %118 = vector.load %arg4[%c2_91, %c0_92, %c0_93] : memref<3x32x32xbf16, #tpu.memory_space<vmem>>, vector<1x32x32xbf16>
    %119 = vector.shape_cast %118 : vector<1x32x32xbf16> to vector<32x32xbf16>
    %c0_94 = arith.constant 0 : index
    %c0_95 = arith.constant 0 : index
    %c2_96 = arith.constant 2 : index
    %120 = vector.load %arg7[%c0_94, %c0_95, %c2_96] : memref<2x32x34xbf16, #tpu.memory_space<vmem>>, vector<1x32x32xbf16>
    %121 = vector.shape_cast %120 : vector<1x32x32xbf16> to vector<32x32xbf16>
    %cst_97 = arith.constant dense<0.000000e+00> : vector<32x32xf32>
    %122 = tpu.matmul %119, %121, %cst_97 {dimension_numbers = #tpu.dot_dimension_numbers<[1], [0], [0], [1], [0, 0, 1, 1], [], []>} : vector<32x32xbf16>, vector<32x32xbf16>, vector<32x32xf32> -> vector<32x32xf32>
    %123 = arith.addf %117, %122 : vector<32x32xf32>
    %c0_98 = arith.constant 0 : index
    %c0_99 = arith.constant 0 : index
    %c0_100 = arith.constant 0 : index
    %124 = vector.load %arg4[%c0_98, %c0_99, %c0_100] : memref<3x32x32xbf16, #tpu.memory_space<vmem>>, vector<1x32x32xbf16>
    %125 = vector.shape_cast %124 : vector<1x32x32xbf16> to vector<32x32xbf16>
    %c1_101 = arith.constant 1 : index
    %c0_102 = arith.constant 0 : index
    %c0_103 = arith.constant 0 : index
    %126 = vector.load %arg7[%c1_101, %c0_102, %c0_103] : memref<2x32x34xbf16, #tpu.memory_space<vmem>>, vector<1x32x32xbf16>
    %127 = vector.shape_cast %126 : vector<1x32x32xbf16> to vector<32x32xbf16>
    %cst_104 = arith.constant dense<0.000000e+00> : vector<32x32xf32>
    %128 = tpu.matmul %125, %127, %cst_104 {dimension_numbers = #tpu.dot_dimension_numbers<[1], [0], [0], [1], [0, 0, 1, 1], [], []>} : vector<32x32xbf16>, vector<32x32xbf16>, vector<32x32xf32> -> vector<32x32xf32>
    %129 = vector.broadcast %104 : vector<32x1xf32> to vector<32x32xf32>
    %130 = arith.addf %129, %128 : vector<32x32xf32>
    %c1_105 = arith.constant 1 : index
    %c0_106 = arith.constant 0 : index
    %c0_107 = arith.constant 0 : index
    %131 = vector.load %arg4[%c1_105, %c0_106, %c0_107] : memref<3x32x32xbf16, #tpu.memory_space<vmem>>, vector<1x32x32xbf16>
    %132 = vector.shape_cast %131 : vector<1x32x32xbf16> to vector<32x32xbf16>
    %c1_108 = arith.constant 1 : index
    %c0_109 = arith.constant 0 : index
    %c1_110 = arith.constant 1 : index
    %133 = vector.load %arg7[%c1_108, %c0_109, %c1_110] : memref<2x32x34xbf16, #tpu.memory_space<vmem>>, vector<1x32x32xbf16>
    %134 = vector.shape_cast %133 : vector<1x32x32xbf16> to vector<32x32xbf16>
    %cst_111 = arith.constant dense<0.000000e+00> : vector<32x32xf32>
    %135 = tpu.matmul %132, %134, %cst_111 {dimension_numbers = #tpu.dot_dimension_numbers<[1], [0], [0], [1], [0, 0, 1, 1], [], []>} : vector<32x32xbf16>, vector<32x32xbf16>, vector<32x32xf32> -> vector<32x32xf32>
    %136 = arith.addf %130, %135 : vector<32x32xf32>
    %c2_112 = arith.constant 2 : index
    %c0_113 = arith.constant 0 : index
    %c0_114 = arith.constant 0 : index
    %137 = vector.load %arg4[%c2_112, %c0_113, %c0_114] : memref<3x32x32xbf16, #tpu.memory_space<vmem>>, vector<1x32x32xbf16>
    %138 = vector.shape_cast %137 : vector<1x32x32xbf16> to vector<32x32xbf16>
    %c1_115 = arith.constant 1 : index
    %c0_116 = arith.constant 0 : index
    %c2_117 = arith.constant 2 : index
    %139 = vector.load %arg7[%c1_115, %c0_116, %c2_117] : memref<2x32x34xbf16, #tpu.memory_space<vmem>>, vector<1x32x32xbf16>
    %140 = vector.shape_cast %139 : vector<1x32x32xbf16> to vector<32x32xbf16>
    %cst_118 = arith.constant dense<0.000000e+00> : vector<32x32xf32>
    %141 = tpu.matmul %138, %140, %cst_118 {dimension_numbers = #tpu.dot_dimension_numbers<[1], [0], [0], [1], [0, 0, 1, 1], [], []>} : vector<32x32xbf16>, vector<32x32xbf16>, vector<32x32xf32> -> vector<32x32xf32>
    %142 = arith.addf %136, %141 : vector<32x32xf32>
    %c0_119 = arith.constant 0 : index
    %c4 = arith.constant 4 : index
    %143 = vector.load %arg5[%c0_119, %c4] : memref<32x6xf32, #tpu.memory_space<vmem>>, vector<32x1xf32>
    %c0_120 = arith.constant 0 : index
    %c5 = arith.constant 5 : index
    %144 = vector.load %arg5[%c0_120, %c5] : memref<32x6xf32, #tpu.memory_space<vmem>>, vector<32x1xf32>
    %145 = arith.mulf %123, %123 : vector<32x32xf32>
    %146 = arith.addf %123, %142 : vector<32x32xf32>
    %147 = arith.mulf %142, %142 : vector<32x32xf32>
    %148 = arith.addf %145, %147 : vector<32x32xf32>
    %cst_121 = arith.constant dense<0.000000e+00> : vector<32xf32>
    %149 = vector.multi_reduction <add>, %146, %cst_121 [1] : vector<32x32xf32> to vector<32xf32>
    %150 = vector.shape_cast %149 : vector<32xf32> to vector<32x1xf32>
    %cst_122 = arith.constant 1.562500e-02 : f32
    %151 = vector.broadcast %cst_122 : f32 to vector<32x1xf32>
    %152 = arith.mulf %150, %151 : vector<32x1xf32>
    %cst_123 = arith.constant dense<0.000000e+00> : vector<32xf32>
    %153 = vector.multi_reduction <add>, %148, %cst_123 [1] : vector<32x32xf32> to vector<32xf32>
    %154 = vector.shape_cast %153 : vector<32xf32> to vector<32x1xf32>
    %cst_124 = arith.constant 1.562500e-02 : f32
    %155 = vector.broadcast %cst_124 : f32 to vector<32x1xf32>
    %156 = arith.mulf %154, %155 : vector<32x1xf32>
    %157 = arith.mulf %152, %152 : vector<32x1xf32>
    %158 = arith.subf %156, %157 : vector<32x1xf32>
    %cst_125 = arith.constant 0.000000e+00 : f32
    %159 = vector.broadcast %cst_125 : f32 to vector<32x1xf32>
    %160 = arith.maximumf %158, %159 : vector<32x1xf32>
    %cst_126 = arith.constant 9.99999974E-6 : f32
    %161 = vector.broadcast %cst_126 : f32 to vector<32x1xf32>
    %162 = arith.addf %160, %161 : vector<32x1xf32>
    %163 = math.rsqrt %162 : vector<32x1xf32>
    %164 = arith.mulf %163, %143 : vector<32x1xf32>
    %165 = arith.mulf %152, %164 : vector<32x1xf32>
    %166 = arith.subf %144, %165 : vector<32x1xf32>
    %167 = vector.broadcast %164 : vector<32x1xf32> to vector<32x32xf32>
    %168 = arith.mulf %123, %167 : vector<32x32xf32>
    %169 = vector.broadcast %166 : vector<32x1xf32> to vector<32x32xf32>
    %170 = arith.addf %168, %169 : vector<32x32xf32>
    %cst_127 = arith.constant 0.000000e+00 : f32
    %171 = vector.broadcast %cst_127 : f32 to vector<32x32xf32>
    %172 = arith.maximumf %170, %171 : vector<32x32xf32>
    %c0_128 = arith.constant 0 : index
    %c0_129 = arith.constant 0 : index
    %c0_130 = arith.constant 0 : index
    %173 = vector.load %arg2[%c0_128, %c0_129, %c0_130] : memref<2x32x1xf32, #tpu.memory_space<vmem>>, vector<1x32x1xf32>
    %174 = vector.shape_cast %173 : vector<1x32x1xf32> to vector<32x1xf32>
    %175 = vector.broadcast %174 : vector<32x1xf32> to vector<32x32xf32>
    %176 = arith.mulf %172, %175 : vector<32x32xf32>
    %177 = vector.broadcast %164 : vector<32x1xf32> to vector<32x32xf32>
    %178 = arith.mulf %142, %177 : vector<32x32xf32>
    %179 = vector.broadcast %166 : vector<32x1xf32> to vector<32x32xf32>
    %180 = arith.addf %178, %179 : vector<32x32xf32>
    %cst_131 = arith.constant 0.000000e+00 : f32
    %181 = vector.broadcast %cst_131 : f32 to vector<32x32xf32>
    %182 = arith.maximumf %180, %181 : vector<32x32xf32>
    %c1_132 = arith.constant 1 : index
    %c0_133 = arith.constant 0 : index
    %c0_134 = arith.constant 0 : index
    %183 = vector.load %arg2[%c1_132, %c0_133, %c0_134] : memref<2x32x1xf32, #tpu.memory_space<vmem>>, vector<1x32x1xf32>
    %184 = vector.shape_cast %183 : vector<1x32x1xf32> to vector<32x1xf32>
    %185 = vector.broadcast %184 : vector<32x1xf32> to vector<32x32xf32>
    %186 = arith.mulf %182, %185 : vector<32x32xf32>
    %c0_135 = arith.constant 0 : index
    %c0_136 = arith.constant 0 : index
    %c0_137 = arith.constant 0 : index
    %187 = vector.load %arg6[%c0_135, %c0_136, %c0_137] : memref<2x32x32xf32, #tpu.memory_space<vmem>>, vector<1x32x32xf32>
    %188 = vector.shape_cast %187 : vector<1x32x32xf32> to vector<32x32xf32>
    %189 = vector.shape_cast %176 : vector<32x32xf32> to vector<1x32x32xf32>
    tpu.vector_store %arg6[%c0_135, %c0_136, %c0_137], %189 {strides = array<i32>} : memref<2x32x32xf32, #tpu.memory_space<vmem>>, vector<1x32x32xf32>,
    %c1_138 = arith.constant 1 : index
    %c0_139 = arith.constant 0 : index
    %c0_140 = arith.constant 0 : index
    %190 = vector.load %arg6[%c1_138, %c0_139, %c0_140] : memref<2x32x32xf32, #tpu.memory_space<vmem>>, vector<1x32x32xf32>
    %191 = vector.shape_cast %190 : vector<1x32x32xf32> to vector<32x32xf32>
    %192 = vector.shape_cast %186 : vector<32x32xf32> to vector<1x32x32xf32>
    tpu.vector_store %arg6[%c1_138, %c0_139, %c0_140], %192 {strides = array<i32>} : memref<2x32x32xf32, #tpu.memory_space<vmem>>, vector<1x32x32xf32>,
    return
  }
  func.func @transform_0(%arg0: i32) -> (i32, i32, i32) {
    %c0_i32 = arith.constant 0 : i32
    %c0_i32_0 = arith.constant 0 : i32
    %c0_i32_1 = arith.constant 0 : i32
    %c0_i32_2 = arith.constant 0 : i32
    return %c0_i32, %c0_i32_0, %c0_i32_1 : i32, i32, i32
  }
  func.func @transform_1(%arg0: i32) -> (i32, i32, i32) {
    %c0_i32 = arith.constant 0 : i32
    %c0_i32_0 = arith.constant 0 : i32
    %c0_i32_1 = arith.constant 0 : i32
    %c0_i32_2 = arith.constant 0 : i32
    return %c0_i32, %c0_i32_0, %c0_i32_1 : i32, i32, i32
  }
  func.func @transform_2(%arg0: i32) -> (i32, i32, i32) {
    %c0_i32 = arith.constant 0 : i32
    %c0_i32_0 = arith.constant 0 : i32
    %c0_i32_1 = arith.constant 0 : i32
    %c0_i32_2 = arith.constant 0 : i32
    return %c0_i32, %c0_i32_0, %c0_i32_1 : i32, i32, i32
  }
  func.func @transform_3(%arg0: i32) -> (i32, i32, i32) {
    %c0_i32 = arith.constant 0 : i32
    %c0_i32_0 = arith.constant 0 : i32
    %c0_i32_1 = arith.constant 0 : i32
    %c0_i32_2 = arith.constant 0 : i32
    return %c0_i32, %c0_i32_0, %c0_i32_1 : i32, i32, i32
  }
  func.func @transform_4(%arg0: i32) -> (i32, i32) {
    %c0_i32 = arith.constant 0 : i32
    %c0_i32_0 = arith.constant 0 : i32
    %c0_i32_1 = arith.constant 0 : i32
    return %c0_i32, %c0_i32_0 : i32, i32
  }
  func.func @transform_5(%arg0: i32) -> (i32, i32, i32) {
    %c0_i32 = arith.constant 0 : i32
    %c0_i32_0 = arith.constant 0 : i32
    %c0_i32_1 = arith.constant 0 : i32
    %c0_i32_2 = arith.constant 0 : i32
    return %c0_i32, %c0_i32_0, %c0_i32_1 : i32, i32, i32
  }
}

</mosaic_0001>

<bundles_post_ra>
// kernel: tpu_custom_call.1
= control target key start
LH: loop header
LB: loop body
LE: loop exit
PB: predicated region body
PF: predicated region fallthrough
CT: control target
= control target key end

     0   :  { %vm48_vm0 = vcmask 1043456   ;;  %vm41_vm1 = vcmask 64512   ;;  %s1723_s24 = smov 127   ;;  %s1724_s25 = smov 126   ;;  %v1725_v11 = vmov 0   ;;  %s2117_s0 = inlined_call_operand.vmem [shape: bf16[2,8,34], index: 0, kind: input, shape index: {}]   ;;  %s2118_s1 = inlined_call_operand.vmem [shape: f32[2,32,1], index: 1, kind: input, shape index: {}]   ;;  %s2119_s2 = inlined_call_operand.vmem [shape: bf16[3,32,8], index: 2, kind: input, shape index: {}]   ;;  %s2120_s3 = inlined_call_operand.vmem [shape: bf16[3,32,32], index: 3, kind: input, shape index: {}]   ;;  %s2121_s4 = inlined_call_operand.vmem [shape: f32[32,6], index: 4, kind: input, shape index: {}]   ;;  %s2122_s5 = inlined_call_operand.hbm [shape: f32[2,32,32], index: 5, kind: output, shape index: {}]  }
   0x1   :  { %v30_v0 = vld [vmem:[%s2117_s0] sm:$0xf]  ;;  %v1415_v1 = vld [vmem:[%s2117_s0 + $0x4] sm:$0xf]  ;;  %v1672_v7 = vld [vmem:[%s2119_s2 + $0x8] sm:$0xff]   ;;  %1650 = vset.pattern.permute.xlu1 %v1725_v11  ;;  %1649 = vset.pattern.permute.xlu0 %v1725_v11 }
   0x2   :  { %v1404_v2 = vcombine.low %v30_v0, %v30_v0  ;;  %v1671_v3 = vld [vmem:[%s2119_s2] sm:$0xff]   ;;  %1631 = vmatprep.subr.msk.bf16.mxu0 %vm48_vm0, %v30_v0  ;;  %v50_v4 = vsel %vm48_vm0, %v30_v0, 0  ;;  %1634 = vmatprep.subr.msk.bf16.mxu1 %vm48_vm0, %v1415_v1  ;;  %v1418_v5 = vcombine.low %v1415_v1, %v1415_v1  ;;  %v289_v6 = vsel %vm48_vm0, %v1415_v1, 0  ;;  %v1673_v8 = vld [vmem:[%s2119_s2 + $0x10] sm:$0xff]   ;;  %v1797_v9 = vld [vmem:[%s2121_s4 + $0x8] sm:$0xff] }
   0x3   :  { %1500 = vmatpush3.bf16.msra.mxu0 %v50_v4  ;;  %1501 = vmatprep.mubr.msk.bf16.mxu0 %vm41_vm1, %v1671_v3  ;;  %v1802_v10 = vld [vmem:[%s2121_s4] sm:$0xff]  ;;  %v1809_v12 = vld [vmem:[%s2121_s4 + $0x10] sm:$0xff]  ;;  %v1816_v13 = vld [vmem:[%s2121_s4 + $0x18] sm:$0xff] }
   0x4   :  { %143 = vrot.lane.b32.xlu0 %v1404_v2, %s1723_s24  ;;  %222 = vrot.lane.b32.xlu1 %v1404_v2, %s1724_s25 }
   0x5   :  { %1518 = vmatpush3.bf16.msra.mxu1 %v289_v6  ;;  %1519 = vmatprep.mubr.msk.bf16.mxu1 %vm41_vm1, %v1671_v3 }
   0x6   :  { %1502 = vmatmul.mubr.msk.bf16.vlgmr.msra.gmra.mrb[0].mxu0 %vm41_vm1, %v1672_v7 }
   0x7   :  { %1507 = vmatprep.mubr.msk.bf16.mxu0 %vm41_vm1, %v1673_v8 }
   0x8   :  { %347 = vrot.lane.b32.xlu0 %v1418_v5, %s1723_s24  ;;  %405 = vrot.lane.b32.xlu1 %v1418_v5, %s1724_s25 }
   0x9   :  { %1520 = vmatmul.mubr.msk.bf16.vlgmr.msra.gmra.mrb[0].mxu1 %vm41_vm1, %v1672_v7 }
   0xa   :  { %1525 = vmatprep.mubr.msk.bf16.mxu1 %vm41_vm1, %v1673_v8 }
   0xc   :  { %108 = vperm.xlu1 %1650, %v1797_v9   ;;  %103 = vperm.xlu0 %1649, %v1802_v10  }
   0xd   :  { %10 = vsyncpa [#allocation4], 0  ;;  %v1674_v17 = vld [vmem:[%s2119_s2 + $0x18] sm:$0xff]   ;;  %v1675_v19 = vld [vmem:[%s2119_s2 + $0x20] sm:$0xff]   ;;  %vm479_vm2 = vcmask 261120   ;;  %v1726_v5 = vmov 1  }
   0xe   :  { %v1676_v24 = vld [vmem:[%s2119_s2 + $0x28] sm:$0xff]   ;;  %s1727_s2 = smov 1   ;;  %vm681_vm3 = vcmask 7168   ;;  %vm684_vm4 = vcmask 277768   ;;  %vm697_vm5 = vcmask 269320  }
   0xf   :  { %701 = vst.msk [vmem:[#allocation2 + $0x10] sm:$0xff] %vm681_vm3, %v1725_v11  ;;  %682 = vst.msk [vmem:[#allocation2] sm:$0xff] %vm681_vm3, %v1725_v11 }
  0x10   :  { %113 = vperm.xlu1 %1650, %v1809_v12   ;;  %118 = vperm.xlu0 %1649, %v1816_v13   ;;  %683 = vst.msk [vmem:[#allocation2 + $0x8] sm:$0xff] %vm681_vm3, %v1725_v11  ;;  %702 = vst.msk [vmem:[#allocation2 + $0x18] sm:$0xff] %vm681_vm3, %v1725_v11 }
  0x11   :  { %703 = vst.msk [vmem:[#allocation2 + $0x10] sm:$0xff] %vm684_vm4, %v1725_v11  ;;  %685 = vst.msk [vmem:[#allocation2] sm:$0xff] %vm684_vm4, %v1725_v11 }
  0x12   :  { %686 = vst.msk [vmem:[#allocation2 + $0x8] sm:$0xff] %vm684_vm4, %v1725_v11  ;;  %704 = vst.msk [vmem:[#allocation2 + $0x18] sm:$0xff] %vm684_vm4, %v1725_v11 }
  0x14   :  { %1651 = vset.pattern.permute.xlu1 %v1726_v5  ;;  %1652 = vset.pattern.permute.xlu0 %v1726_v5 }
  0x76   :  { %v144_v14 = vpop.permute.xlu0 %143  ;;  %v223_v15 = vpop.permute.xlu1 %222 }
  0x77   :  { %v152_v16 = vsel %vm48_vm0, %v144_v14, 0  ;;  %1632 = vmatprep.subr.msk.bf16.mxu0 %vm48_vm0, %v144_v14  ;;  %v231_v18 = vsel %vm48_vm0, %v223_v15, 0 }
  0x78   :  { %1506 = vmatpush3.bf16.msra.mxu0 %v152_v16 }
  0x79   :  { %1633 = vmatprep.subr.msk.bf16.mxu0 %vm48_vm0, %v223_v15 }
  0x7a   :  { %v348_v20 = vpop.permute.xlu0 %347  ;;  %v406_v21 = vpop.permute.xlu1 %405 }
  0x7b   :  { %v350_v22 = vsel %vm48_vm0, %v348_v20, 0  ;;  %1508 = vmatmul.mubr.msk.bf16.vlgmr.msra.gmra.mrb[0].mxu0 %vm41_vm1, %v1674_v17  ;;  %1635 = vmatprep.subr.msk.bf16.mxu1 %vm48_vm0, %v348_v20  ;;  %v408_v23 = vsel %vm48_vm0, %v406_v21, 0 }
  0x7c   :  { %1524 = vmatpush3.bf16.msra.mxu1 %v350_v22  ;;  %1512 = vmatpush3.bf16.msra.mxu0 %v231_v18 }
  0x7d   :  { %1513 = vmatprep.mubr.msk.bf16.mxu0 %vm41_vm1, %v1675_v19  ;;  %1636 = vmatprep.subr.msk.bf16.mxu1 %vm48_vm0, %v406_v21 }
  0x7f   :  { %1526 = vmatmul.mubr.msk.bf16.vlgmr.msra.gmra.mrb[0].mxu1 %vm41_vm1, %v1674_v17 }
  0x80   :  { %1530 = vmatpush3.bf16.msra.mxu1 %v408_v23  ;;  %1531 = vmatprep.mubr.msk.bf16.mxu1 %vm41_vm1, %v1675_v19 }
  0x87   :  { %1514 = vmatmul.mubr.msk.bf16.vlgmr.msra.gmra.mrb[0].mxu0 %vm41_vm1, %v1676_v24 }
  0x8b   :  { %1532 = vmatmul.mubr.msk.bf16.vlgmr.msra.gmra.mrb[0].mxu1 %vm41_vm1, %v1676_v24  ;;  %v109_v25 = vpop.permute.xlu1 %108  ;;  %v104_v26 = vpop.permute.xlu0 %103 }
  0x8f   :  { %v114_v29 = vpop.permute.xlu1 %113  ;;  %v119_v34 = vpop.permute.xlu0 %118 }
 0x15a   :  { %v1515_v27 = vpop.f32.mrb[0].mxu0 }
 0x15b   :  { %v267_v28 = vpop.f32.mrb[1].mxu0  ;;  %v1843_v33 = vadd.f32 %v1515_v27, %v114_v29 }
 0x15c   :  { %v1516_v30 = vpop.f32.mrb[2].mxu0  ;;  %v1847_v37 = vadd.f32 %v267_v28, %v104_v26 }
 0x15d   :  { %v270_v31 = vpop.f32.mrb[3].mxu0  ;;  %v1855_v43 = vadd.f32 %v1516_v30, %v119_v34  ;;  %v465_v61 = vmul.f32 %v1843_v33, %v1843_v33 }
 0x15e   :  { %v1533_v32 = vpop.f32.mrb[0].mxu1  ;;  %v1857_v44 = vadd.f32 %v270_v31, %v109_v25  ;;  %v463_v53 = vmul.f32 %v1847_v37, %v1847_v37 }
 0x15f   :  { %v1845_v35 = vadd.f32 %v1533_v32, %v114_v29  ;;  %v444_v36 = vpop.f32.mrb[1].mxu1  ;;  %v466_v62 = vmul.f32 %v1855_v43, %v1855_v43 }
 0x160   :  { %v1849_v38 = vadd.f32 %v444_v36, %v104_v26  ;;  %v1534_v39 = vpop.f32.mrb[2].mxu1  ;;  %v464_v55 = vmul.f32 %v1857_v44, %v1857_v44 }
 0x161   :  { %v1851_v40 = vadd.f32 %v1534_v39, %v119_v34  ;;  %v447_v41 = vpop.f32.mrb[3].mxu1  ;;  %v469_v42 = vadd.f32 %v1845_v35, %v1843_v33  ;;  %v473_v57 = vmul.f32 %v1845_v35, %v1845_v35 }
 0x162   :  { %v1859_v45 = vadd.f32 %v447_v41, %v109_v25  ;;  %v467_v46 = vadd.f32 %v1849_v38, %v1847_v37  ;;  %v471_v48 = vmul.f32 %v1849_v38, %v1849_v38 }
 0x163   :  { %v486_v47 = vsel %vm479_vm2, %v469_v42, 0.0  ;;  %v470_v51 = vadd.f32 %v1851_v40, %v1855_v43  ;;  %v474_v60 = vmul.f32 %v1851_v40, %v1851_v40  ;;  %v477_v0 = vadd.f32 %v473_v57, %v465_v61 }
 0x164   :  { %487 = vadd.xlane.f32.xlu0 %v486_v47  ;;  %v480_v49 = vsel %vm479_vm2, %v467_v46, 0.0  ;;  %v468_v50 = vadd.f32 %v1859_v45, %v1857_v44  ;;  %v472_v52 = vmul.f32 %v1859_v45, %v1859_v45  ;;  %v475_v56 = vadd.f32 %v471_v48, %v463_v53 }
 0x165   :  { %481 = vadd.xlane.f32.xlu1 %v480_v49  ;;  %v489_v58 = vsel %vm479_vm2, %v470_v51, 0.0  ;;  %v478_v2 = vadd.f32 %v474_v60, %v466_v62  ;;  %v502_v3 = vsel %vm479_vm2, %v477_v0, 0.0  ;;  %v1907_v0 = vld [vmem:[%s2118_s1 + $0x8] sm:$0xff] }
 0x166   :  { %v483_v54 = vsel %vm479_vm2, %v468_v50, 0.0  ;;  %v476_v59 = vadd.f32 %v472_v52, %v464_v55  ;;  %v496_v63 = vsel %vm479_vm2, %v475_v56, 0.0 }
 0x167   :  { %v505_v4 = vsel %vm479_vm2, %v478_v2, 0.0  ;;  %v1921_v2 = vld [vmem:[%s2118_s1 + $0x10] sm:$0xff] }
 0x168   :  { %484 = vadd.xlane.f32.xlu0 %v483_v54  ;;  %v499_v1 = vsel %vm479_vm2, %v476_v59, 0.0 }
 0x169   :  { %490 = vadd.xlane.f32.xlu1 %v489_v58 }
 0x16c   :  { %497 = vadd.xlane.f32.xlu0 %v496_v63  ;;  %v1902_v63 = vld [vmem:[%s2118_s1] sm:$0xff] }
 0x16d   :  { %500 = vadd.xlane.f32.xlu1 %v499_v1  ;;  %v1916_v1 = vld [vmem:[%s2118_s1 + $0x20] sm:$0xff] }
 0x170   :  { %503 = vadd.xlane.f32.xlu0 %v502_v3  ;;  %v1928_v3 = vld [vmem:[%s2118_s1 + $0x28] sm:$0xff] }
 0x171   :  { %506 = vadd.xlane.f32.xlu1 %v505_v4  ;;  %v1728_v4 = vmov 2  }
 0x1f1   :  { %v488_v6 = vpop.xlane.xlu0 %487 }
 0x1f2   :  { %v482_v7 = vpop.xlane.xlu1 %481  ;;  %v494_v18 = vmul.f32 0.015625, %v488_v6 }
 0x1f3   :  { %v492_v14 = vmul.f32 0.015625, %v482_v7 }
 0x1f4   :  { %v514_v28 = vmul.f32 %v494_v18, %v494_v18 }
 0x1f5   :  { %v485_v8 = vpop.xlane.xlu0 %484  ;;  %v512_v19 = vmul.f32 %v492_v14, %v492_v14 }
 0x1f6   :  { %v491_v15 = vpop.xlane.xlu1 %490  ;;  %v493_v16 = vmul.f32 0.015625, %v485_v8 }
 0x1f7   :  { %v495_v23 = vmul.f32 0.015625, %v491_v15 }
 0x1f8   :  { %v513_v22 = vmul.f32 %v493_v16, %v493_v16 }
 0x1f9   :  { %v498_v17 = vpop.xlane.xlu0 %497  ;;  %v515_v32 = vmul.f32 %v495_v23, %v495_v23 }
 0x1fa   :  { %v508_v20 = vmul.f32 0.015625, %v498_v17  ;;  %v501_v21 = vpop.xlane.xlu1 %500 }
 0x1fb   :  { %v509_v24 = vmul.f32 0.015625, %v501_v21 }
 0x1fc   :  { %v516_v25 = vsub.f32 %v508_v20, %v512_v19  ;;  %v1945_v19 = vld [vmem:[%s2118_s1 + $0x18] sm:$0xff] }
 0x1fd   :  { %v517_v26 = vsub.f32 %v509_v24, %v513_v22  ;;  %v504_v27 = vpop.xlane.xlu0 %503  ;;  %v1952_v20 = vld [vmem:[%s2118_s1 + $0x38] sm:$0xff] }
 0x1fe   :  { %v520_v29 = vmax.f32 %v516_v25, 0.0  ;;  %v510_v30 = vmul.f32 0.015625, %v504_v27  ;;  %v507_v31 = vpop.xlane.xlu1 %506 }
 0x1ff   :  { %v521_v34 = vmax.f32 %v517_v26, 0.0  ;;  %v511_v36 = vmul.f32 0.015625, %v507_v31 }
 0x200   :  { %v524_v39 = vadd.f32 1e-05, %v520_v29  ;;  %v518_v41 = vsub.f32 %v510_v30, %v514_v28 }
 0x201   :  { %v525_v42 = vadd.f32 1e-05, %v521_v34  ;;  %v519_v46 = vsub.f32 %v511_v36, %v515_v32 }
 0x202   :  { %1683 = vrsqrt.f32 %v524_v39  ;;  %v522_v47 = vmax.f32 %v518_v41, 0.0 }
 0x203   :  { %1685 = vrsqrt.f32 %v525_v42  ;;  %v523_v48 = vmax.f32 %v519_v46, 0.0 }
 0x204   :  { %v526_v49 = vadd.f32 1e-05, %v522_v47 }
 0x205   :  { %v527_v50 = vadd.f32 1e-05, %v523_v48 }
 0x206   :  { %1687 = vrsqrt.f32 %v526_v49 }
 0x207   :  { %1689 = vrsqrt.f32 %v527_v50 }
 0x20c   :  { %v1684_v51 = vpop.eup %1683 }
 0x20d   :  { %v1686_v52 = vpop.eup %1685  ;;  %v532_v53 = vmul.f32 %v1684_v51, %v1802_v10 }
 0x20e   :  { %v533_v54 = vmul.f32 %v1686_v52, %v1797_v9 }
 0x20f   :  { %v536_v55 = vmul.f32 %v532_v53, %v492_v14 }
 0x210   :  { %v1688_v56 = vpop.eup %1687  ;;  %v537_v57 = vmul.f32 %v533_v54, %v493_v16 }
 0x211   :  { %v1690_v58 = vpop.eup %1689  ;;  %544 = vrot.lane.b32.xlu0 %v536_v55, %s1727_s2  ;;  %v534_v59 = vmul.f32 %v1688_v56, %v1809_v12 }
 0x212   :  { %546 = vrot.lane.b32.xlu1 %v537_v57, %s1727_s2  ;;  %v535_v60 = vmul.f32 %v1690_v58, %v1816_v13 }
 0x213   :  { %v538_v61 = vmul.f32 %v534_v59, %v494_v18  ;;  %v1938_v18 = vld [vmem:[%s2118_s1 + $0x30] sm:$0xff] }
 0x214   :  { %v539_v62 = vmul.f32 %v535_v60, %v495_v23 }
 0x216   :  { %550 = vrot.lane.b32.xlu0 %v539_v62, %s1727_s2  ;;  %548 = vrot.lane.b32.xlu1 %v538_v61, %s1727_s2 }
 0x21a   :  { %567 = vperm.xlu0 %1652, %v533_v54   ;;  %562 = vperm.xlu1 %1651, %v532_v53  }
 0x21e   :  { %572 = vperm.xlu0 %1652, %v534_v59   ;;  %577 = vperm.xlu1 %1651, %v535_v60  }
 0x222   :  { %1653 = vset.pattern.permute.xlu1 %v1725_v11  ;;  %1654 = vset.pattern.permute.xlu0 %v1725_v11 }
 0x223   :  { %618 = vperm.xlu1 %1653, %v1902_v63   ;;  %623 = vperm.xlu0 %1654, %v1907_v0  }
 0x227   :  { %659 = vperm.xlu1 %1653, %v1916_v1   ;;  %628 = vperm.xlu0 %1654, %v1921_v2  }
 0x22b   :  { %664 = vperm.xlu1 %1653, %v1928_v3   ;;  %1655 = vset.pattern.permute.xlu0 %v1728_v4 }
 0x22f   :  { %1656 = vset.pattern.permute.xlu1 %v1728_v4 }
 0x283   :  { %v545_v5 = vpop.permute.xlu0 %544 }
 0x284   :  { %v556_v6 = vsub.f32 %v1802_v10, %v545_v5  ;;  %v547_v7 = vpop.permute.xlu1 %546 }
 0x285   :  { %v557_v17 = vsub.f32 %v1797_v9, %v547_v7 }
 0x286   :  { %586 = vperm.xlu1 %1656, %v556_v6  }
 0x288   :  { %v549_v8 = vpop.permute.xlu1 %548  ;;  %v551_v14 = vpop.permute.xlu0 %550 }
 0x289   :  { %v558_v15 = vsub.f32 %v1809_v12, %v549_v8  ;;  %v559_v16 = vsub.f32 %v1816_v13, %v551_v14 }
 0x28b   :  { %596 = vperm.xlu0 %1655, %v558_v15   ;;  %601 = vperm.xlu1 %1656, %v559_v16  }
 0x28f   :  { %1658 = vset.pattern.permute.xlu0 %v1725_v11  ;;  %591 = vperm.xlu1 %1656, %v557_v17  }
 0x290   :  { %669 = vperm.xlu0 %1658, %v1938_v18  }
 0x293   :  { %1657 = vset.pattern.permute.xlu1 %v1725_v11 }
 0x294   :  { %633 = vperm.xlu1 %1657, %v1945_v19  }
 0x298   :  { %674 = vperm.xlu1 %1657, %v1952_v20  }
 0x299   :  { %v563_v21 = vpop.permute.xlu1 %562  ;;  %v568_v24 = vpop.permute.xlu0 %567 }
 0x29a   :  { %v580_v31 = vmul.f32 %v1847_v37, %v563_v21  ;;  %v640_v32 = vmul.f32 %v1849_v38, %v563_v21  ;;  %v581_v42 = vmul.f32 %v1857_v44, %v568_v24  ;;  %v641_v46 = vmul.f32 %v1859_v45, %v568_v24 }
 0x29d   :  { %v578_v22 = vpop.permute.xlu1 %577  ;;  %v573_v26 = vpop.permute.xlu0 %572 }
 0x29e   :  { %v583_v47 = vmul.f32 %v1855_v43, %v578_v22  ;;  %v582_v48 = vmul.f32 %v1843_v33, %v573_v26  ;;  %v642_v49 = vmul.f32 %v1845_v35, %v573_v26  ;;  %v643_v55 = vmul.f32 %v1851_v40, %v578_v22  ;;  %v1677_v22 = vld [vmem:[%s2120_s3] sm:$0xff]  }
 0x29f   :  { %1539 = vmatprep.mubr.msk.bf16.mxu0 %vm479_vm2, %v1677_v22  ;;  %1563 = vmatprep.mubr.msk.bf16.mxu1 %vm479_vm2, %v1677_v22 }
 0x2a2   :  { %v619_v23 = vpop.permute.xlu1 %618  ;;  %v624_v27 = vpop.permute.xlu0 %623 }
 0x2a6   :  { %v660_v25 = vpop.permute.xlu1 %659  ;;  %v629_v30 = vpop.permute.xlu0 %628 }
 0x2aa   :  { %v665_v28 = vpop.permute.xlu1 %664 }
 0x305   :  { %v587_v29 = vpop.permute.xlu1 %586 }
 0x306   :  { %v604_v34 = vadd.f32 %v587_v29, %v580_v31  ;;  %v644_v36 = vadd.f32 %v640_v32, %v587_v29  ;;  %v1678_v31 = vld [vmem:[%s2120_s3 + $0x8] sm:$0xff]   ;;  %v1679_v32 = vld [vmem:[%s2120_s3 + $0x10] sm:$0xff]  }
 0x308   :  { %v608_v50 = vmax.f32 %v604_v34, 0.0  ;;  %v648_v51 = vmax.f32 %v644_v36, 0.0  ;;  %v1729_v34 = vmov 3  }
 0x309   :  { %1660 = vset.pattern.permute.xlu1 %v1729_v34  ;;  %1659 = vset.pattern.permute.xlu0 %v1729_v34 }
 0x30a   :  { %v602_v39 = vpop.permute.xlu1 %601  ;;  %v597_v41 = vpop.permute.xlu0 %596  ;;  %v636_v58 = vmul.f32 %v619_v23, %v608_v50  ;;  %v677_v45 = vmul.f32 %v660_v25, %v648_v51 }
 0x30b   :  { %v607_v37 = vadd.f32 %v602_v39, %v583_v47  ;;  %v606_v53 = vadd.f32 %v597_v41, %v582_v48  ;;  %v646_v56 = vadd.f32 %v642_v49, %v597_v41  ;;  %v647_v59 = vadd.f32 %v643_v55, %v602_v39  ;;  %v1681_v47 = vld [vmem:[%s2120_s3 + $0x20] sm:$0xff]  }
 0x30d   :  { %v611_v43 = vmax.f32 %v607_v37, 0.0  ;;  %v610_v60 = vmax.f32 %v606_v53, 0.0  ;;  %v650_v62 = vmax.f32 %v646_v56, 0.0  ;;  %v651_v8 = vmax.f32 %v647_v59, 0.0 }
 0x30e   :  { %v592_v52 = vpop.permute.xlu1 %591 }
 0x30f   :  { %v605_v38 = vadd.f32 %v592_v52, %v581_v42  ;;  %v645_v54 = vadd.f32 %v641_v46, %v592_v52  ;;  %v670_v4 = vpop.permute.xlu0 %669  ;;  %v638_v14 = vmul.f32 %v629_v30, %v610_v60  ;;  %v1680_v46 = vld [vmem:[%s2120_s3 + $0x18] sm:$0xff]   ;;  %v1682_v52 = vld [vmem:[%s2120_s3 + $0x28] sm:$0xff]   ;;  %s1732_s3 = smov [#allocation3]  }
 0x310   :  { %v679_v40 = vmul.f32 %v670_v4, %v650_v62 }
 0x311   :  { %v609_v57 = vmax.f32 %v605_v38, 0.0  ;;  %v649_v44 = vmax.f32 %v645_v54, 0.0 }
 0x313   :  { %v637_v33 = vmul.f32 %v624_v27, %v609_v57  ;;  %v678_v61 = vmul.f32 %v665_v28, %v649_v44  ;;  %v634_v35 = vpop.permute.xlu1 %633 }
 0x314   :  { %v639_v5 = vmul.f32 %v634_v35, %v611_v43 }
 0x315   :  { %v705_v6 = vpack.c.bf16 %v678_v61, %v677_v45  ;;  %v687_v7 = vpack.c.bf16 %v637_v33, %v636_v58 }
 0x316   :  { %v688_v17 = vpack.c.bf16 %v639_v5, %v638_v14 }
 0x317   :  { %v675_v15 = vpop.permute.xlu1 %674  ;;  %709 = vrot.lane.b32.xlu1 %v705_v6, %s1727_s2  ;;  %691 = vrot.lane.b32.xlu0 %v687_v7, %s1727_s2 }
 0x318   :  { %v680_v16 = vmul.f32 %v675_v15, %v651_v8 }
 0x31a   :  { %v706_v21 = vpack.c.bf16 %v680_v16, %v679_v40 }
 0x31b   :  { %693 = vrot.lane.b32.xlu0 %v688_v17, %s1727_s2 }
 0x31c   :  { %711 = vrot.lane.b32.xlu1 %v706_v21, %s1727_s2 }
 0x389   :  { %v710_v23 = vpop.permute.xlu1 %709  ;;  %v692_v24 = vpop.permute.xlu0 %691 }
 0x38a   :  { %715 = vst.msk [vmem:[#allocation2 + $0x10] sm:$0xff] %vm697_vm5, %v710_v23  ;;  %698 = vst.msk [vmem:[#allocation2] sm:$0xff] %vm697_vm5, %v692_v24 }
 0x38d   :  { %v694_v25 = vpop.permute.xlu0 %693 }
 0x38e   :  { %699 = vst.msk [vmem:[#allocation2 + $0x8] sm:$0xff] %vm697_vm5, %v694_v25  ;;  %v712_v26 = vpop.permute.xlu1 %711 }
 0x38f   :  { %716 = vst.msk [vmem:[#allocation2 + $0x18] sm:$0xff] %vm697_vm5, %v712_v26 }
 0x391   :  { %v978_v27 = vld [vmem:[#allocation2 + $0x10] sm:$0xff]  ;;  %v725_v28 = vld [vmem:[#allocation2] sm:$0xff] }
 0x392   :  { %1559 = vmatprep.subr.bf16.mxu1 %v978_v27  ;;  %1035 = vrot.lane.b32.xlu1 %v978_v27, %s1723_s24 }
 0x393   :  { %833 = vrot.lane.b32.xlu0 %v725_v28, %s1723_s24  ;;  %1535 = vmatprep.subr.bf16.mxu0 %v725_v28 }
 0x394   :  { %1536 = vmatpush3.bf16.msra.mxu0 %v725_v28  ;;  %1560 = vmatpush3.bf16.msra.mxu1 %v978_v27 }
 0x395   :  { %v726_v29 = vld [vmem:[#allocation2 + $0x8] sm:$0xff] }
 0x396   :  { %1537 = vmatprep.subr.bf16.mxu0 %v726_v29  ;;  %v979_v30 = vld [vmem:[#allocation2 + $0x18] sm:$0xff] }
 0x397   :  { %835 = vrot.lane.b32.xlu0 %v726_v29, %s1723_s24  ;;  %1037 = vrot.lane.b32.xlu1 %v979_v30, %s1723_s24 }
 0x398   :  { %1538 = vmatpush3.bf16.msra.mxu0 %v726_v29  ;;  %1561 = vmatprep.subr.bf16.mxu1 %v979_v30 }
 0x399   :  { %1562 = vmatpush3.bf16.msra.mxu1 %v979_v30 }
 0x39b   :  { %913 = vrot.lane.b32.xlu0 %v725_v28, %s1724_s25  ;;  %1094 = vrot.lane.b32.xlu1 %v978_v27, %s1724_s25 }
 0x39c   :  { %1540 = vmatmul.mubr.msk.bf16.vlgmr.msra.gmra.mrb[4].mxu0 %vm479_vm2, %v1678_v31  ;;  %1564 = vmatmul.mubr.msk.bf16.vlgmr.msra.gmra.mrb[4].mxu1 %vm479_vm2, %v1678_v31 }
 0x39d   :  { %1547 = vmatprep.mubr.msk.bf16.mxu0 %vm479_vm2, %v1679_v32  ;;  %1571 = vmatprep.mubr.msk.bf16.mxu1 %vm479_vm2, %v1679_v32 }
 0x39f   :  { %915 = vrot.lane.b32.xlu0 %v726_v29, %s1724_s25  ;;  %1096 = vrot.lane.b32.xlu1 %v979_v30, %s1724_s25 }
 0x3a3   :  { %799 = vperm.xlu1 %1660, %v1797_v9   ;;  %794 = vperm.xlu0 %1659, %v1802_v10  }
 0x3a7   :  { %804 = vperm.xlu1 %1660, %v1809_v12   ;;  %809 = vperm.xlu0 %1659, %v1816_v13  }
 0x404   :  { %v1036_v36 = vpop.permute.xlu1 %1035 }
 0x405   :  { %v834_v39 = vpop.permute.xlu0 %833  ;;  %1567 = vmatprep.subr.bf16.mxu1 %v1036_v36 }
 0x406   :  { %1543 = vmatprep.subr.bf16.mxu0 %v834_v39  ;;  %1568 = vmatpush3.bf16.msra.mxu1 %v1036_v36 }
 0x407   :  { %1544 = vmatpush3.bf16.msra.mxu0 %v834_v39 }
 0x409   :  { %v836_v41 = vpop.permute.xlu0 %835  ;;  %v1038_v42 = vpop.permute.xlu1 %1037 }
 0x40a   :  { %1545 = vmatprep.subr.bf16.mxu0 %v836_v41  ;;  %1569 = vmatprep.subr.bf16.mxu1 %v1038_v42 }
 0x40b   :  { %1546 = vmatpush3.bf16.msra.mxu0 %v836_v41  ;;  %1570 = vmatpush3.bf16.msra.mxu1 %v1038_v42 }
 0x40d   :  { %v914_v48 = vpop.permute.xlu0 %913  ;;  %v1095_v49 = vpop.permute.xlu1 %1094 }
 0x40e   :  { %1548 = vmatmul.mubr.msk.bf16.vlgmr.msra.gmra.mrb[4].mxu0 %vm479_vm2, %v1680_v46  ;;  %1551 = vmatprep.subr.bf16.mxu0 %v914_v48 }
 0x40f   :  { %1552 = vmatpush3.bf16.msra.mxu0 %v914_v48  ;;  %1572 = vmatmul.mubr.msk.bf16.vlgmr.msra.gmra.mrb[4].mxu1 %vm479_vm2, %v1680_v46  ;;  %v1730_v46 = vmov 4  }
 0x410   :  { %1575 = vmatprep.subr.bf16.mxu1 %v1095_v49  ;;  %1555 = vmatprep.mubr.msk.bf16.mxu0 %vm479_vm2, %v1681_v47 }
 0x411   :  { %1576 = vmatpush3.bf16.msra.mxu1 %v1095_v49  ;;  %v916_v50 = vpop.permute.xlu0 %915  ;;  %v1097_v51 = vpop.permute.xlu1 %1096  ;;  %1579 = vmatprep.mubr.msk.bf16.mxu1 %vm479_vm2, %v1681_v47 }
 0x412   :  { %1553 = vmatprep.subr.bf16.mxu0 %v916_v50  ;;  %1577 = vmatprep.subr.bf16.mxu1 %v1097_v51 }
 0x413   :  { %1554 = vmatpush3.bf16.msra.mxu0 %v916_v50  ;;  %1661 = vset.pattern.permute.xlu1 %v1730_v46 }
 0x414   :  { %1662 = vset.pattern.permute.xlu0 %v1730_v46 }
 0x415   :  { %1578 = vmatpush3.bf16.msra.mxu1 %v1097_v51 }
 0x41a   :  { %1556 = vmatmul.mubr.msk.bf16.vlgmr.msra.gmra.mrb[4].mxu0 %vm479_vm2, %v1682_v52 }
 0x41b   :  { %1580 = vmatmul.mubr.msk.bf16.vlgmr.msra.gmra.mrb[4].mxu1 %vm479_vm2, %v1682_v52 }
 0x422   :  { %v800_v37 = vpop.permute.xlu1 %799  ;;  %v795_v53 = vpop.permute.xlu0 %794 }
 0x426   :  { %v805_v38 = vpop.permute.xlu1 %804  ;;  %v810_v55 = vpop.permute.xlu0 %809 }
 0x4ed   :  { %v1557_v54 = vpop.f32.mrb[4].mxu0 }
 0x4ee   :  { %v2017_v56 = vadd.f32 %v1557_v54, %v805_v38  ;;  %v959_v57 = vpop.f32.mrb[5].mxu0  ;;  %v1581_v44 = vpop.f32.mrb[4].mxu1 }
 0x4ef   :  { %v2019_v58 = vadd.f32 %v959_v57, %v795_v53  ;;  %v2021_v45 = vadd.f32 %v1581_v44, %v805_v38  ;;  %v1558_v59 = vpop.f32.mrb[6].mxu0  ;;  %v1134_v43 = vpop.f32.mrb[5].mxu1 }
 0x4f0   :  { %v2023_v60 = vadd.f32 %v1134_v43, %v795_v53  ;;  %v2025_v33 = vadd.f32 %v1558_v59, %v810_v55  ;;  %v962_v61 = vpop.f32.mrb[7].mxu0  ;;  %v1582_v35 = vpop.f32.mrb[6].mxu1  ;;  %v1155_v26 = vmul.f32 %v2017_v56, %v2017_v56 }
 0x4f1   :  { %v2027_v62 = vadd.f32 %v962_v61, %v800_v37  ;;  %v2029_v4 = vadd.f32 %v1582_v35, %v810_v55  ;;  %v1137_v5 = vpop.f32.mrb[7].mxu1  ;;  %v1159_v6 = vadd.f32 %v2021_v45, %v2017_v56  ;;  %v1153_v40 = vmul.f32 %v2019_v58, %v2019_v58 }
 0x4f2   :  { %v2033_v7 = vadd.f32 %v1137_v5, %v800_v37  ;;  %v1157_v8 = vadd.f32 %v2023_v60, %v2019_v58  ;;  %v1161_v16 = vmul.f32 %v2023_v60, %v2023_v60  ;;  %v1163_v27 = vmul.f32 %v2021_v45, %v2021_v45 }
 0x4f3   :  { %v1175_v14 = vsel %vm479_vm2, %v1159_v6, 0.0  ;;  %v1160_v15 = vadd.f32 %v2029_v4, %v2025_v33  ;;  %v1154_v22 = vmul.f32 %v2027_v62, %v2027_v62  ;;  %v1156_v30 = vmul.f32 %v2025_v33, %v2025_v33 }
 0x4f4   :  { %1176 = vadd.xlane.f32.xlu0 %v1175_v14  ;;  %v1169_v17 = vsel %vm479_vm2, %v1157_v8, 0.0  ;;  %v1158_v21 = vadd.f32 %v2033_v7, %v2027_v62  ;;  %v1162_v23 = vmul.f32 %v2033_v7, %v2033_v7  ;;  %v1165_v25 = vadd.f32 %v1161_v16, %v1153_v40 }
 0x4f5   :  { %1170 = vadd.xlane.f32.xlu1 %v1169_v17  ;;  %v1178_v28 = vsel %vm479_vm2, %v1160_v15, 0.0  ;;  %v1164_v31 = vmul.f32 %v2029_v4, %v2029_v4  ;;  %v1167_v34 = vadd.f32 %v1163_v27, %v1155_v26 }
 0x4f6   :  { %v1172_v24 = vsel %vm479_vm2, %v1158_v21, 0.0  ;;  %v1166_v29 = vadd.f32 %v1162_v23, %v1154_v22  ;;  %v1185_v32 = vsel %vm479_vm2, %v1165_v25, 0.0 }
 0x4f7   :  { %v1168_v39 = vadd.f32 %v1164_v31, %v1156_v30  ;;  %v1191_v41 = vsel %vm479_vm2, %v1167_v34, 0.0 }
 0x4f8   :  { %1173 = vadd.xlane.f32.xlu0 %v1172_v24  ;;  %v1188_v36 = vsel %vm479_vm2, %v1166_v29, 0.0 }
 0x4f9   :  { %1179 = vadd.xlane.f32.xlu1 %v1178_v28  ;;  %v1194_v42 = vsel %vm479_vm2, %v1168_v39, 0.0 }
 0x4fc   :  { %1186 = vadd.xlane.f32.xlu0 %v1185_v32 }
 0x4fd   :  { %1189 = vadd.xlane.f32.xlu1 %v1188_v36 }
 0x500   :  { %1192 = vadd.xlane.f32.xlu0 %v1191_v41 }
 0x501   :  { %1195 = vadd.xlane.f32.xlu1 %v1194_v42 }
 0x581   :  { %v1177_v47 = vpop.xlane.xlu0 %1176 }
 0x582   :  { %v1171_v48 = vpop.xlane.xlu1 %1170  ;;  %v1183_v53 = vmul.f32 0.015625, %v1177_v47 }
 0x583   :  { %v1181_v50 = vmul.f32 0.015625, %v1171_v48  ;;  %v1731_v48 = vmov 5  }
 0x584   :  { %v1203_v5 = vmul.f32 %v1183_v53, %v1183_v53 }
 0x585   :  { %v1174_v49 = vpop.xlane.xlu0 %1173  ;;  %v1201_v38 = vmul.f32 %v1181_v50, %v1181_v50 }
 0x586   :  { %v1180_v51 = vpop.xlane.xlu1 %1179  ;;  %v1182_v52 = vmul.f32 0.015625, %v1174_v49 }
 0x587   :  { %v1184_v44 = vmul.f32 0.015625, %v1180_v51 }
 0x588   :  { %v1202_v57 = vmul.f32 %v1182_v52, %v1182_v52 }
 0x589   :  { %v1187_v37 = vpop.xlane.xlu0 %1186  ;;  %v1204_v15 = vmul.f32 %v1184_v44, %v1184_v44 }
 0x58a   :  { %v1197_v54 = vmul.f32 0.015625, %v1187_v37  ;;  %v1190_v55 = vpop.xlane.xlu1 %1189 }
 0x58b   :  { %v1198_v59 = vmul.f32 0.015625, %v1190_v55 }
 0x58c   :  { %v1205_v43 = vsub.f32 %v1197_v54, %v1201_v38 }
 0x58d   :  { %v1206_v61 = vsub.f32 %v1198_v59, %v1202_v57  ;;  %v1193_v35 = vpop.xlane.xlu0 %1192 }
 0x58e   :  { %v1209_v6 = vmax.f32 %v1205_v43, 0.0  ;;  %v1199_v8 = vmul.f32 0.015625, %v1193_v35  ;;  %v1196_v14 = vpop.xlane.xlu1 %1195 }
 0x58f   :  { %v1210_v40 = vmax.f32 %v1206_v61, 0.0  ;;  %v1200_v16 = vmul.f32 0.015625, %v1196_v14 }
 0x590   :  { %v1213_v17 = vadd.f32 1e-05, %v1209_v6  ;;  %v1207_v21 = vsub.f32 %v1199_v8, %v1203_v5 }
 0x591   :  { %v1214_v22 = vadd.f32 1e-05, %v1210_v40  ;;  %v1208_v23 = vsub.f32 %v1200_v16, %v1204_v15 }
 0x592   :  { %1691 = vrsqrt.f32 %v1213_v17  ;;  %v1211_v24 = vmax.f32 %v1207_v21, 0.0 }
 0x593   :  { %1693 = vrsqrt.f32 %v1214_v22  ;;  %v1212_v25 = vmax.f32 %v1208_v23, 0.0 }
 0x594   :  { %v1215_v26 = vadd.f32 1e-05, %v1211_v24 }
 0x595   :  { %v1216_v27 = vadd.f32 1e-05, %v1212_v25 }
 0x596   :  { %1695 = vrsqrt.f32 %v1215_v26 }
 0x597   :  { %1697 = vrsqrt.f32 %v1216_v27 }
 0x59c   :  { %v1692_v28 = vpop.eup %1691 }
 0x59d   :  { %v1694_v29 = vpop.eup %1693  ;;  %v1221_v30 = vmul.f32 %v1692_v28, %v1802_v10 }
 0x59e   :  { %v1222_v31 = vmul.f32 %v1694_v29, %v1797_v9 }
 0x59f   :  { %v1225_v32 = vmul.f32 %v1221_v30, %v1181_v50 }
 0x5a0   :  { %v1696_v34 = vpop.eup %1695  ;;  %v1226_v36 = vmul.f32 %v1222_v31, %v1182_v52 }
 0x5a1   :  { %v1698_v39 = vpop.eup %1697  ;;  %1233 = vrot.lane.b32.xlu0 %v1225_v32, %s1727_s2  ;;  %v1223_v41 = vmul.f32 %v1696_v34, %v1809_v12 }
 0x5a2   :  { %1235 = vrot.lane.b32.xlu1 %v1226_v36, %s1727_s2  ;;  %v1224_v42 = vmul.f32 %v1698_v39, %v1816_v13 }
 0x5a3   :  { %v1227_v46 = vmul.f32 %v1223_v41, %v1183_v53 }
 0x5a4   :  { %v1228_v47 = vmul.f32 %v1224_v42, %v1184_v44 }
 0x5a6   :  { %1239 = vrot.lane.b32.xlu0 %v1228_v47, %s1727_s2  ;;  %1237 = vrot.lane.b32.xlu1 %v1227_v46, %s1727_s2  ;;  %s1383_s2 = sshll.u32 %s1732_s3, 4  ;;  %s1384_s2 = int_to_ptr.vmem [resolvable:$true] %s1383_s2 }
 0x5a7   :  { %s1699_s17 = scalar_lea.vmem %s1384_s2, 1024  ;;  %p1704_p1 = scmp.lt.s32.totalorder %s1384_s2, %s1384_s2 }
 0x5a8   :  { %p1700_p0 = scmp.ne.s32.totalorder %s1384_s2, %s1699_s17  ;;  %p1705_p2 = scmp.lt.s32.totalorder %s1699_s17, %s1699_s17 }
 0x5aa   :  { %1256 = vperm.xlu0 %1662, %v1222_v31   ;;  %1251 = vperm.xlu1 %1661, %v1221_v30   ;;  %p1706_p3 = por %p1705_p2, %p1704_p1 }
 0x5ac   :  { %p1707_p4 = pnand %p1706_p3, %p1700_p0 }
 0x5ae   :  { %1261 = vperm.xlu1 %1661, %v1223_v41   ;;  %1664 = vset.pattern.permute.xlu0 %v1725_v11 }
 0x5af   :  { %1312 = vperm.xlu0 %1664, %v1907_v0  }
 0x5b2   :  { %1266 = vperm.xlu1 %1661, %v1224_v42  }
 0x5b3   :  { %1347 = vperm.xlu0 %1664, %v1916_v1  }
 0x5b6   :  { %1663 = vset.pattern.permute.xlu1 %v1725_v11 }
 0x5b7   :  { %1307 = vperm.xlu1 %1663, %v1902_v63   ;;  %1666 = vset.pattern.permute.xlu0 %v1731_v48 }
 0x5bb   :  { %1317 = vperm.xlu1 %1663, %v1921_v2  }
 0x5bf   :  { %1322 = vperm.xlu1 %1663, %v1945_v19  }
 0x5c3   :  { %1352 = vperm.xlu1 %1663, %v1928_v3  }
 0x5c7   :  { %1665 = vset.pattern.permute.xlu1 %v1731_v48 }
 0x613   :  { %v1234_v49 = vpop.permute.xlu0 %1233 }
 0x614   :  { %v1245_v50 = vsub.f32 %v1802_v10, %v1234_v49  ;;  %v1236_v0 = vpop.permute.xlu1 %1235 }
 0x615   :  { %v1246_v2 = vsub.f32 %v1797_v9, %v1236_v0 }
 0x616   :  { %1275 = vperm.xlu0 %1666, %v1245_v50  }
 0x618   :  { %v1238_v51 = vpop.permute.xlu1 %1237  ;;  %v1240_v1 = vpop.permute.xlu0 %1239 }
 0x619   :  { %v1247_v52 = vsub.f32 %v1809_v12, %v1238_v51  ;;  %v1248_v63 = vsub.f32 %v1816_v13, %v1240_v1 }
 0x61b   :  { %1285 = vperm.xlu1 %1665, %v1247_v52   ;;  %1290 = vperm.xlu0 %1666, %v1248_v63  }
 0x61f   :  { %1280 = vperm.xlu1 %1665, %v1246_v2   ;;  %1667 = vset.pattern.permute.xlu0 %v1725_v11 }
 0x620   :  { %1357 = vperm.xlu0 %1667, %v1938_v18  }
 0x623   :  { %1668 = vset.pattern.permute.xlu1 %v1725_v11 }
 0x624   :  { %1362 = vperm.xlu1 %1668, %v1952_v20  }
 0x629   :  { %v1252_v10 = vpop.permute.xlu1 %1251  ;;  %v1257_v12 = vpop.permute.xlu0 %1256 }
 0x62a   :  { %v1269_v9 = vmul.f32 %v2019_v58, %v1252_v10  ;;  %v1329_v55 = vmul.f32 %v2023_v60, %v1252_v10  ;;  %v1270_v60 = vmul.f32 %v2027_v62, %v1257_v12 }
 0x62d   :  { %v1262_v3 = vpop.permute.xlu1 %1261 }
 0x62e   :  { %v1313_v53 = vpop.permute.xlu0 %1312  ;;  %v1271_v20 = vmul.f32 %v2017_v56, %v1262_v3  ;;  %v1331_v61 = vmul.f32 %v2021_v45, %v1262_v3  ;;  %v1330_v56 = vmul.f32 %v2033_v7, %v1257_v12 }
 0x631   :  { %v1267_v19 = vpop.permute.xlu1 %1266 }
 0x632   :  { %v1348_v38 = vpop.permute.xlu0 %1347  ;;  %v1272_v35 = vmul.f32 %v2025_v33, %v1267_v19  ;;  %v1332_v16 = vmul.f32 %v2029_v4, %v1267_v19 }
 0x636   :  { %v1308_v37 = vpop.permute.xlu1 %1307 }
 0x63a   :  { %v1318_v13 = vpop.permute.xlu1 %1317 }
 0x63e   :  { %v1323_v54 = vpop.permute.xlu1 %1322 }
 0x642   :  { %v1353_v44 = vpop.permute.xlu1 %1352 }
 0x695   :  { %v1276_v57 = vpop.permute.xlu0 %1275 }
 0x696   :  { %v1293_v18 = vadd.f32 %v1276_v57, %v1269_v9  ;;  %v1333_v59 = vadd.f32 %v1329_v55, %v1276_v57 }
 0x698   :  { %v1297_v11 = vmax.f32 %v1293_v18, 0.0  ;;  %v1337_v43 = vmax.f32 %v1333_v59, 0.0 }
 0x69a   :  { %v1325_v5 = vmul.f32 %v1308_v37, %v1297_v11  ;;  %v1365_v6 = vmul.f32 %v1348_v38, %v1337_v43  ;;  %v1286_v8 = vpop.permute.xlu1 %1285  ;;  %v1291_v14 = vpop.permute.xlu0 %1290 }
 0x69b   :  { %v1295_v15 = vadd.f32 %v1286_v8, %v1271_v20  ;;  %v1335_v58 = vadd.f32 %v1331_v61, %v1286_v8  ;;  %v1296_v40 = vadd.f32 %v1291_v14, %v1272_v35  ;;  %v1336_v21 = vadd.f32 %v1332_v16, %v1291_v14 }
 0x69c   :  { %1369 = vst.msk [vmem:[#allocation3] sm:$0xff] %vm479_vm2, %v1325_v5  ;;  %1374 = vst.msk [vmem:[#allocation3 + $0x20] sm:$0xff] %vm479_vm2, %v1365_v6 }
 0x69d   :  { %v1299_v45 = vmax.f32 %v1295_v15, 0.0  ;;  %v1339_v17 = vmax.f32 %v1335_v58, 0.0  ;;  %v1300_v33 = vmax.f32 %v1296_v40, 0.0  ;;  %v1340_v7 = vmax.f32 %v1336_v21, 0.0 }
 0x69e   :  { %v1281_v22 = vpop.permute.xlu1 %1280 }
 0x69f   :  { %v1327_v23 = vmul.f32 %v1318_v13, %v1299_v45  ;;  %v1328_v24 = vmul.f32 %v1323_v54, %v1300_v33  ;;  %v1294_v25 = vadd.f32 %v1281_v22, %v1270_v60  ;;  %v1334_v26 = vadd.f32 %v1330_v56, %v1281_v22  ;;  %v1358_v27 = vpop.permute.xlu0 %1357 }
 0x6a0   :  { %v1367_v28 = vmul.f32 %v1358_v27, %v1339_v17 }
 0x6a1   :  { %1371 = vst.msk [vmem:[#allocation3 + $0x10] sm:$0xff] %vm479_vm2, %v1327_v23  ;;  %1372 = vst.msk [vmem:[#allocation3 + $0x18] sm:$0xff] %vm479_vm2, %v1328_v24  ;;  %v1298_v62 = vmax.f32 %v1294_v25, 0.0  ;;  %v1338_v4 = vmax.f32 %v1334_v26, 0.0 }
 0x6a2   :  { %1376 = vst.msk [vmem:[#allocation3 + $0x30] sm:$0xff] %vm479_vm2, %v1367_v28 }
 0x6a3   :  { %v1326_v29 = vmul.f32 %v1313_v53, %v1298_v62  ;;  %v1366_v30 = vmul.f32 %v1353_v44, %v1338_v4  ;;  %v1363_v31 = vpop.permute.xlu1 %1362 }
 0x6a4   :  { %v1368_v32 = vmul.f32 %v1363_v31, %v1340_v7 }
 0x6a5   :  { %1370 = vst.msk [vmem:[#allocation3 + $0x8] sm:$0xff] %vm479_vm2, %v1326_v29  ;;  %1375 = vst.msk [vmem:[#allocation3 + $0x28] sm:$0xff] %vm479_vm2, %v1366_v30 }
 0x6a6   :  { %1377 = vst.msk [vmem:[#allocation3 + $0x38] sm:$0xff] %vm479_vm2, %v1368_v32 }
 0x6a7   :  { %1710 = shalt.err (!%p1707_p4)
}
 0x6a8   :  { %s1711_s20 = scalar_lea.hbm %s2122_s5, 1024 }
 0x6a9   :  { %p1712_p5 = scmp.ne.s32.totalorder %s2122_s5, %s1711_s20  ;;  %p1715_p6 = scmp.lt.u32.totalorder %s1711_s20, %s2122_s5 }
 0x6ab   :  { %p1717_p7 = pnand %p1715_p6, %p1712_p5 }
 0x6ad   :  { %1720 = shalt.err (!%p1717_p7)
}
 0x6ae   :  { %s1733_s26 = smov 128   ;;  %s1734_s27 = smov 8  }
 0x6af   :  { %1389 = dma.vmem_to_hbm [thread:$0]  %s1384_s2, 1024, %s2122_s5, [#allocation4], %s1733_s26, %s1733_s26, %s1734_s27  }
 0x6b0   :  { %1721 = dma.done.wait [#allocation4], 1024  }
 0x6b1   :  { %1722 = vsyncadd [#allocation4], 4294966272 }
 0x6b2   :  { %1393 = vsyncpa [#allocation4], 1 }

</bundles_post_ra>
